<compile_context>
chip_gen: v6e
topology: v6e:2x2x1
jax: 0.10.0
libtpu: 0.0.40
codegen_flags: <defaults>
</compile_context>

<pallas_src>
import jax
import jax.numpy as jnp
import numpy as np
from jax.experimental import pallas as pl
from jax.experimental.pallas import tpu as pltpu


def _round_up(x, m):
    return (x + m - 1) // m * m


def _lstm_kernel(g_ref, whh_ref, h_out_ref, h_scr, c_scr):
    """One grid step = T_BLOCK timesteps of the LSTM recurrence.

    g_ref    : (T_BLOCK, B_BLK, 4*Hp)  precomputed gate preactivations (x proj + bias)
    whh_ref  : (Hp, 4*Hp)              hidden->gates weights (whole-array VMEM resident)
    h_out_ref: (T_BLOCK, B_BLK, Hp)    hidden states emitted for these timesteps
    h_scr/c_scr : (B_BLK, Hp)          recurrent state carried across grid steps
    """
    # Time (axis 1) is the innermost grid axis -> fires once per batch block.
    @pl.when(pl.program_id(1) == 0)
    def _():
        h_scr[...] = jnp.zeros_like(h_scr)
        c_scr[...] = jnp.zeros_like(c_scr)

    t_block = g_ref.shape[0]
    Hp = h_scr.shape[-1]
    whh = whh_ref[...]                      # (Hp, 4Hp), loaded once per grid step

    def step(s, carry):
        h, c = carry
        gates = g_ref[s] + jnp.dot(h, whh, preferred_element_type=jnp.float32)
        # PyTorch LSTM gate order: i, f, g, o.  Hp is a multiple of 128, so each
        # slice is a lane-aligned window (no cross-lane relayout).
        i_g = jax.nn.sigmoid(gates[:, 0 * Hp:1 * Hp])
        f_g = jax.nn.sigmoid(gates[:, 1 * Hp:2 * Hp])
        g_g = jnp.tanh(gates[:, 2 * Hp:3 * Hp])
        o_g = jax.nn.sigmoid(gates[:, 3 * Hp:4 * Hp])
        c_new = f_g * c + i_g * g_g
        h_new = o_g * jnp.tanh(c_new)
        h_out_ref[s] = h_new
        return h_new, c_new

    h_fin, c_fin = jax.lax.fori_loop(
        0, t_block, step, (h_scr[...], c_scr[...]), unroll=True)
    h_scr[...] = h_fin
    c_scr[...] = c_fin


def encoder_block_pallas(x, params, *, t_block=16, b_block=None):
    """x: (B, T, input_size) float32 -> (B, T, output_size) float32."""
    B, T, I = x.shape
    H = params["w_hh"].shape[1]
    O = params["w_lin"].shape[0]
    f32 = jnp.float32

    Hp = _round_up(H, 128)                 # lane-aligned hidden size
    Bp = _round_up(B, 8)                   # full sublanes
    t_block = max(1, min(t_block, T))
    Tp = _round_up(T, t_block)
    if b_block is None:
        # >=2 batch blocks lets v7x's 2 TensorCores split the "parallel" axis;
        # harmless (just sequential blocks) on single-core chips.
        b_block = Bp // 2 if Bp % 16 == 0 else Bp

    # ---- zero-pad params so gate k occupies the lane-aligned [k*Hp, (k+1)*Hp) slab.
    def pad_gates(a):                      # (4H, ...) -> (4Hp, ...), per-gate zero pad
        a2 = a.reshape(4, H, -1)
        a2 = jnp.pad(a2, ((0, 0), (0, Hp - H), (0, 0)))
        return a2.reshape(4 * Hp, -1)

    w_ih_p = pad_gates(params["w_ih"].astype(f32))                      # (4Hp, I)
    w_hh_p = jnp.pad(pad_gates(params["w_hh"].astype(f32)),
                     ((0, 0), (0, Hp - H)))                             # (4Hp, Hp)
    bias_p = pad_gates((params["b_ih"] + params["b_hh"]).astype(f32))[:, 0]  # (4Hp,)
    w_lin_p = jnp.pad(params["w_lin"].astype(f32), ((0, 0), (0, Hp - H)))    # (O, Hp)

    # ---- pad activations: batch to Bp, time to whole T_BLOCKs.
    x_p = jnp.pad(x.astype(f32), ((0, Bp - B), (0, Tp - T), (0, 0)))    # (Bp, Tp, I)

    # ---- hoisted input projection: one big MXU matmul, time-major output
    #      (the (B,T)->(T,B) transpose is folded into the einsum).
    g = jnp.einsum("bti,gi->tbg", x_p, w_ih_p,
                   preferred_element_type=jnp.float32) + bias_p         # (Tp, Bp, 4Hp)

    whh_t = w_hh_p.T                                                    # (Hp, 4Hp)

    grid = (Bp // b_block, Tp // t_block)
    h_all = pl.pallas_call(
        _lstm_kernel,
        out_shape=jax.ShapeDtypeStruct((Tp, Bp, Hp), f32),
        grid_spec=pltpu.PrefetchScalarGridSpec(
            num_scalar_prefetch=0,
            grid=grid,
            in_specs=[
                pl.BlockSpec((t_block, b_block, 4 * Hp),
                             lambda b, t: (t, b, 0)),                   # G block
                # Resident weight: whole array in VMEM, single copy
                # (no per-step DMA, no double buffering).
                pl.BlockSpec(memory_space=pltpu.MemorySpace.VMEM),      # W_hh^T
            ],
            out_specs=pl.BlockSpec((t_block, b_block, Hp),
                                   lambda b, t: (t, b, 0)),             # h slab
            scratch_shapes=[
                pltpu.VMEM((b_block, Hp), f32),    # h carry
                pltpu.VMEM((b_block, Hp), f32),    # c carry
            ],
        ),
        compiler_params=pltpu.CompilerParams(
            dimension_semantics=("parallel", "arbitrary")),
    )(g, whh_t)

    # ---- hoisted output Linear: one big matmul, transpose back folded in.
    y = jnp.einsum("tbh,oh->bto", h_all, w_lin_p,
                   preferred_element_type=jnp.float32) + params["b_lin"].astype(f32)
    return y[:B, :T, :]


def encoder_block_ref(x, params):
    """Pure-JAX reference (matches nn.LSTM(batch_first=True) + nn.Linear)."""
    B, T, I = x.shape
    H = params["w_hh"].shape[1]

    def step(carry, x_t):
        h, c = carry
        gates = (x_t @ params["w_ih"].T + params["b_ih"]
                 + h @ params["w_hh"].T + params["b_hh"])
        i_g = jax.nn.sigmoid(gates[:, 0 * H:1 * H])
        f_g = jax.nn.sigmoid(gates[:, 1 * H:2 * H])
        g_g = jnp.tanh(gates[:, 2 * H:3 * H])
        o_g = jax.nn.sigmoid(gates[:, 3 * H:4 * H])
        c = f_g * c + i_g * g_g
        h = o_g * jnp.tanh(c)
        return (h, c), h

    h0 = jnp.zeros((B, H), jnp.float32)
    c0 = jnp.zeros((B, H), jnp.float32)
    _, hs = jax.lax.scan(step, (h0, c0), jnp.transpose(x, (1, 0, 2)))
    hs = jnp.transpose(hs, (1, 0, 2))              # (B, T, H)
    return hs @ params["w_lin"].T + params["b_lin"]


def init_params(key, input_size, hidden_size, output_size):
    ks = jax.random.split(key, 6)
    k_lstm = 1.0 / np.sqrt(hidden_size)    # PyTorch nn.LSTM init scale
    k_lin = 1.0 / np.sqrt(hidden_size)     # PyTorch nn.Linear init scale
    u = lambda k, shape, s: jax.random.uniform(k, shape, jnp.float32, -s, s)
    return {
        "w_ih": u(ks[0], (4 * hidden_size, input_size), k_lstm),
        "w_hh": u(ks[1], (4 * hidden_size, hidden_size), k_lstm),
        "b_ih": u(ks[2], (4 * hidden_size,), k_lstm),
        "b_hh": u(ks[3], (4 * hidden_size,), k_lstm),
        "w_lin": u(ks[4], (output_size, hidden_size), k_lin),
        "b_lin": u(ks[5], (output_size,), k_lin),
    }


if __name__ == "__main__":
    B, T = 2, 8
    input_size, hidden_size, output_size = 4, 32, 16

    key = jax.random.PRNGKey(0)
    k_x, k_p = jax.random.split(key)
    x = jax.random.normal(k_x, (B, T, input_size), jnp.float32)
    params = init_params(k_p, input_size, hidden_size, output_size)

    y = jax.block_until_ready(encoder_block_pallas(x, params))
    y_ref = jax.block_until_ready(encoder_block_ref(x, params))

    assert y.shape == (B, T, output_size)
    np.testing.assert_allclose(np.asarray(y), np.asarray(y_ref),
                               rtol=1e-5, atol=1e-5)
    print("KERNEL_OK")
</pallas_src>

<mosaic_0001>
module attributes {stable_mosaic.version = 11 : i64} {
  func.func @_lstm_kernel(%arg0: i32, %arg1: i32, %arg2: memref<8x8x512xf32, #tpu.memory_space<vmem>>, %arg3: memref<128x512xf32, #tpu.memory_space<vmem>>, %arg4: memref<8x8x128xf32, #tpu.memory_space<vmem>>, %arg5: memref<8x128xf32, #tpu.memory_space<vmem>>, %arg6: memref<8x128xf32, #tpu.memory_space<vmem>>) attributes {dimension_semantics = [#tpu.dimension_semantics<parallel>, #tpu.dimension_semantics<arbitrary>], iteration_bounds = array<i64: 1, 1>, scalar_prefetch = 0 : i64, scratch_operands = 2 : i64, tpu.core_type = #tpu.core_type<tc>, window_params = [{transform_indices = @transform_0, window_bounds = array<i64: 8, 8, 512>}, {pipeline_mode = #tpu.pipeline_mode<synchronous>, transform_indices = @transform_1, window_bounds = array<i64: 128, 512>}, {transform_indices = @transform_2, window_bounds = array<i64: 8, 8, 128>}]} {
    %c0_i32 = arith.constant 0 : i32
    %0 = arith.cmpi eq, %arg1, %c0_i32 : i32
    %1 = arith.extui %0 : i1 to i32
    %c0_i32_0 = arith.constant 0 : i32
    %2 = arith.cmpi ne, %1, %c0_i32_0 : i32
    scf.if %2 {
      %cst_74 = arith.constant 0.000000e+00 : f32
      %280 = vector.broadcast %cst_74 : f32 to vector<8x128xf32>
      %c0_75 = arith.constant 0 : index
      %c0_76 = arith.constant 0 : index
      %281 = vector.load %arg5[%c0_75, %c0_76] : memref<8x128xf32, #tpu.memory_space<vmem>>, vector<8x128xf32>
      tpu.vector_store %arg5[%c0_75, %c0_76], %280 {strides = array<i32>} : memref<8x128xf32, #tpu.memory_space<vmem>>, vector<8x128xf32>,
      %cst_77 = arith.constant 0.000000e+00 : f32
      %282 = vector.broadcast %cst_77 : f32 to vector<8x128xf32>
      %c0_78 = arith.constant 0 : index
      %c0_79 = arith.constant 0 : index
      %283 = vector.load %arg6[%c0_78, %c0_79] : memref<8x128xf32, #tpu.memory_space<vmem>>, vector<8x128xf32>
      tpu.vector_store %arg6[%c0_78, %c0_79], %282 {strides = array<i32>} : memref<8x128xf32, #tpu.memory_space<vmem>>, vector<8x128xf32>,
    } else {
    }
    %c0 = arith.constant 0 : index
    %c0_1 = arith.constant 0 : index
    %3 = vector.load %arg3[%c0, %c0_1] : memref<128x512xf32, #tpu.memory_space<vmem>>, vector<128x512xf32>
    %c0_2 = arith.constant 0 : index
    %c0_3 = arith.constant 0 : index
    %4 = vector.load %arg5[%c0_2, %c0_3] : memref<8x128xf32, #tpu.memory_space<vmem>>, vector<8x128xf32>
    %c0_4 = arith.constant 0 : index
    %c0_5 = arith.constant 0 : index
    %5 = vector.load %arg6[%c0_4, %c0_5] : memref<8x128xf32, #tpu.memory_space<vmem>>, vector<8x128xf32>
    %c0_i32_6 = arith.constant 0 : i32
    %6 = arith.index_cast %c0_i32_6 : i32 to index
    %c0_7 = arith.constant 0 : index
    %c0_8 = arith.constant 0 : index
    %7 = vector.load %arg2[%6, %c0_7, %c0_8] : memref<8x8x512xf32, #tpu.memory_space<vmem>>, vector<1x8x512xf32>
    %8 = vector.shape_cast %7 : vector<1x8x512xf32> to vector<8x512xf32>
    %cst = arith.constant dense<0.000000e+00> : vector<8x512xf32>
    %9 = tpu.matmul %4, %3, %cst {dimension_numbers = #tpu.dot_dimension_numbers<[1], [0], [0], [1], [0, 0, 1, 1], [], []>} : vector<8x128xf32>, vector<128x512xf32>, vector<8x512xf32> -> vector<8x512xf32>
    %10 = arith.addf %8, %9 : vector<8x512xf32>
    %11 = vector.extract_strided_slice %10 {offsets = [0, 0], sizes = [8, 128], strides = [1, 1]} : vector<8x512xf32> to vector<8x128xf32>
    %12 = arith.negf %11 : vector<8x128xf32>
    %13 = math.exp %12 : vector<8x128xf32>
    %cst_9 = arith.constant 1.000000e+00 : f32
    %14 = vector.broadcast %cst_9 : f32 to vector<8x128xf32>
    %15 = arith.addf %14, %13 : vector<8x128xf32>
    %16 = arith.divf %14, %15 : vector<8x128xf32>
    %17 = vector.extract_strided_slice %10 {offsets = [0, 128], sizes = [8, 128], strides = [1, 1]} : vector<8x512xf32> to vector<8x128xf32>
    %18 = arith.negf %17 : vector<8x128xf32>
    %19 = math.exp %18 : vector<8x128xf32>
    %cst_10 = arith.constant 1.000000e+00 : f32
    %20 = vector.broadcast %cst_10 : f32 to vector<8x128xf32>
    %21 = arith.addf %20, %19 : vector<8x128xf32>
    %22 = arith.divf %20, %21 : vector<8x128xf32>
    %23 = vector.extract_strided_slice %10 {offsets = [0, 256], sizes = [8, 128], strides = [1, 1]} : vector<8x512xf32> to vector<8x128xf32>
    %24 = math.tanh %23 : vector<8x128xf32>
    %25 = vector.extract_strided_slice %10 {offsets = [0, 384], sizes = [8, 128], strides = [1, 1]} : vector<8x512xf32> to vector<8x128xf32>
    %26 = arith.negf %25 : vector<8x128xf32>
    %27 = math.exp %26 : vector<8x128xf32>
    %cst_11 = arith.constant 1.000000e+00 : f32
    %28 = vector.broadcast %cst_11 : f32 to vector<8x128xf32>
    %29 = arith.addf %28, %27 : vector<8x128xf32>
    %30 = arith.divf %28, %29 : vector<8x128xf32>
    %31 = arith.mulf %22, %5 : vector<8x128xf32>
    %32 = arith.mulf %16, %24 : vector<8x128xf32>
    %33 = arith.addf %31, %32 : vector<8x128xf32>
    %34 = math.tanh %33 : vector<8x128xf32>
    %35 = arith.mulf %30, %34 : vector<8x128xf32>
    %36 = arith.index_cast %c0_i32_6 : i32 to index
    %c0_12 = arith.constant 0 : index
    %c0_13 = arith.constant 0 : index
    %37 = vector.load %arg4[%36, %c0_12, %c0_13] : memref<8x8x128xf32, #tpu.memory_space<vmem>>, vector<1x8x128xf32>
    %38 = vector.shape_cast %37 : vector<1x8x128xf32> to vector<8x128xf32>
    %39 = vector.shape_cast %35 : vector<8x128xf32> to vector<1x8x128xf32>
    tpu.vector_store %arg4[%36, %c0_12, %c0_13], %39 {strides = array<i32>} : memref<8x8x128xf32, #tpu.memory_space<vmem>>, vector<1x8x128xf32>,
    %c1_i32 = arith.constant 1 : i32
    %40 = arith.index_cast %c1_i32 : i32 to index
    %c0_14 = arith.constant 0 : index
    %c0_15 = arith.constant 0 : index
    %41 = vector.load %arg2[%40, %c0_14, %c0_15] : memref<8x8x512xf32, #tpu.memory_space<vmem>>, vector<1x8x512xf32>
    %42 = vector.shape_cast %41 : vector<1x8x512xf32> to vector<8x512xf32>
    %cst_16 = arith.constant dense<0.000000e+00> : vector<8x512xf32>
    %43 = tpu.matmul %35, %3, %cst_16 {dimension_numbers = #tpu.dot_dimension_numbers<[1], [0], [0], [1], [0, 0, 1, 1], [], []>} : vector<8x128xf32>, vector<128x512xf32>, vector<8x512xf32> -> vector<8x512xf32>
    %44 = arith.addf %42, %43 : vector<8x512xf32>
    %45 = vector.extract_strided_slice %44 {offsets = [0, 0], sizes = [8, 128], strides = [1, 1]} : vector<8x512xf32> to vector<8x128xf32>
    %46 = arith.negf %45 : vector<8x128xf32>
    %47 = math.exp %46 : vector<8x128xf32>
    %cst_17 = arith.constant 1.000000e+00 : f32
    %48 = vector.broadcast %cst_17 : f32 to vector<8x128xf32>
    %49 = arith.addf %48, %47 : vector<8x128xf32>
    %50 = arith.divf %48, %49 : vector<8x128xf32>
    %51 = vector.extract_strided_slice %44 {offsets = [0, 128], sizes = [8, 128], strides = [1, 1]} : vector<8x512xf32> to vector<8x128xf32>
    %52 = arith.negf %51 : vector<8x128xf32>
    %53 = math.exp %52 : vector<8x128xf32>
    %cst_18 = arith.constant 1.000000e+00 : f32
    %54 = vector.broadcast %cst_18 : f32 to vector<8x128xf32>
    %55 = arith.addf %54, %53 : vector<8x128xf32>
    %56 = arith.divf %54, %55 : vector<8x128xf32>
    %57 = vector.extract_strided_slice %44 {offsets = [0, 256], sizes = [8, 128], strides = [1, 1]} : vector<8x512xf32> to vector<8x128xf32>
    %58 = math.tanh %57 : vector<8x128xf32>
    %59 = vector.extract_strided_slice %44 {offsets = [0, 384], sizes = [8, 128], strides = [1, 1]} : vector<8x512xf32> to vector<8x128xf32>
    %60 = arith.negf %59 : vector<8x128xf32>
    %61 = math.exp %60 : vector<8x128xf32>
    %cst_19 = arith.constant 1.000000e+00 : f32
    %62 = vector.broadcast %cst_19 : f32 to vector<8x128xf32>
    %63 = arith.addf %62, %61 : vector<8x128xf32>
    %64 = arith.divf %62, %63 : vector<8x128xf32>
    %65 = arith.mulf %56, %33 : vector<8x128xf32>
    %66 = arith.mulf %50, %58 : vector<8x128xf32>
    %67 = arith.addf %65, %66 : vector<8x128xf32>
    %68 = math.tanh %67 : vector<8x128xf32>
    %69 = arith.mulf %64, %68 : vector<8x128xf32>
    %70 = arith.index_cast %c1_i32 : i32 to index
    %c0_20 = arith.constant 0 : index
    %c0_21 = arith.constant 0 : index
    %71 = vector.load %arg4[%70, %c0_20, %c0_21] : memref<8x8x128xf32, #tpu.memory_space<vmem>>, vector<1x8x128xf32>
    %72 = vector.shape_cast %71 : vector<1x8x128xf32> to vector<8x128xf32>
    %73 = vector.shape_cast %69 : vector<8x128xf32> to vector<1x8x128xf32>
    tpu.vector_store %arg4[%70, %c0_20, %c0_21], %73 {strides = array<i32>} : memref<8x8x128xf32, #tpu.memory_space<vmem>>, vector<1x8x128xf32>,
    %c2_i32 = arith.constant 2 : i32
    %74 = arith.index_cast %c2_i32 : i32 to index
    %c0_22 = arith.constant 0 : index
    %c0_23 = arith.constant 0 : index
    %75 = vector.load %arg2[%74, %c0_22, %c0_23] : memref<8x8x512xf32, #tpu.memory_space<vmem>>, vector<1x8x512xf32>
    %76 = vector.shape_cast %75 : vector<1x8x512xf32> to vector<8x512xf32>
    %cst_24 = arith.constant dense<0.000000e+00> : vector<8x512xf32>
    %77 = tpu.matmul %69, %3, %cst_24 {dimension_numbers = #tpu.dot_dimension_numbers<[1], [0], [0], [1], [0, 0, 1, 1], [], []>} : vector<8x128xf32>, vector<128x512xf32>, vector<8x512xf32> -> vector<8x512xf32>
    %78 = arith.addf %76, %77 : vector<8x512xf32>
    %79 = vector.extract_strided_slice %78 {offsets = [0, 0], sizes = [8, 128], strides = [1, 1]} : vector<8x512xf32> to vector<8x128xf32>
    %80 = arith.negf %79 : vector<8x128xf32>
    %81 = math.exp %80 : vector<8x128xf32>
    %cst_25 = arith.constant 1.000000e+00 : f32
    %82 = vector.broadcast %cst_25 : f32 to vector<8x128xf32>
    %83 = arith.addf %82, %81 : vector<8x128xf32>
    %84 = arith.divf %82, %83 : vector<8x128xf32>
    %85 = vector.extract_strided_slice %78 {offsets = [0, 128], sizes = [8, 128], strides = [1, 1]} : vector<8x512xf32> to vector<8x128xf32>
    %86 = arith.negf %85 : vector<8x128xf32>
    %87 = math.exp %86 : vector<8x128xf32>
    %cst_26 = arith.constant 1.000000e+00 : f32
    %88 = vector.broadcast %cst_26 : f32 to vector<8x128xf32>
    %89 = arith.addf %88, %87 : vector<8x128xf32>
    %90 = arith.divf %88, %89 : vector<8x128xf32>
    %91 = vector.extract_strided_slice %78 {offsets = [0, 256], sizes = [8, 128], strides = [1, 1]} : vector<8x512xf32> to vector<8x128xf32>
    %92 = math.tanh %91 : vector<8x128xf32>
    %93 = vector.extract_strided_slice %78 {offsets = [0, 384], sizes = [8, 128], strides = [1, 1]} : vector<8x512xf32> to vector<8x128xf32>
    %94 = arith.negf %93 : vector<8x128xf32>
    %95 = math.exp %94 : vector<8x128xf32>
    %cst_27 = arith.constant 1.000000e+00 : f32
    %96 = vector.broadcast %cst_27 : f32 to vector<8x128xf32>
    %97 = arith.addf %96, %95 : vector<8x128xf32>
    %98 = arith.divf %96, %97 : vector<8x128xf32>
    %99 = arith.mulf %90, %67 : vector<8x128xf32>
    %100 = arith.mulf %84, %92 : vector<8x128xf32>
    %101 = arith.addf %99, %100 : vector<8x128xf32>
    %102 = math.tanh %101 : vector<8x128xf32>
    %103 = arith.mulf %98, %102 : vector<8x128xf32>
    %104 = arith.index_cast %c2_i32 : i32 to index
    %c0_28 = arith.constant 0 : index
    %c0_29 = arith.constant 0 : index
    %105 = vector.load %arg4[%104, %c0_28, %c0_29] : memref<8x8x128xf32, #tpu.memory_space<vmem>>, vector<1x8x128xf32>
    %106 = vector.shape_cast %105 : vector<1x8x128xf32> to vector<8x128xf32>
    %107 = vector.shape_cast %103 : vector<8x128xf32> to vector<1x8x128xf32>
    tpu.vector_store %arg4[%104, %c0_28, %c0_29], %107 {strides = array<i32>} : memref<8x8x128xf32, #tpu.memory_space<vmem>>, vector<1x8x128xf32>,
    %c3_i32 = arith.constant 3 : i32
    %108 = arith.index_cast %c3_i32 : i32 to index
    %c0_30 = arith.constant 0 : index
    %c0_31 = arith.constant 0 : index
    %109 = vector.load %arg2[%108, %c0_30, %c0_31] : memref<8x8x512xf32, #tpu.memory_space<vmem>>, vector<1x8x512xf32>
    %110 = vector.shape_cast %109 : vector<1x8x512xf32> to vector<8x512xf32>
    %cst_32 = arith.constant dense<0.000000e+00> : vector<8x512xf32>
    %111 = tpu.matmul %103, %3, %cst_32 {dimension_numbers = #tpu.dot_dimension_numbers<[1], [0], [0], [1], [0, 0, 1, 1], [], []>} : vector<8x128xf32>, vector<128x512xf32>, vector<8x512xf32> -> vector<8x512xf32>
    %112 = arith.addf %110, %111 : vector<8x512xf32>
    %113 = vector.extract_strided_slice %112 {offsets = [0, 0], sizes = [8, 128], strides = [1, 1]} : vector<8x512xf32> to vector<8x128xf32>
    %114 = arith.negf %113 : vector<8x128xf32>
    %115 = math.exp %114 : vector<8x128xf32>
    %cst_33 = arith.constant 1.000000e+00 : f32
    %116 = vector.broadcast %cst_33 : f32 to vector<8x128xf32>
    %117 = arith.addf %116, %115 : vector<8x128xf32>
    %118 = arith.divf %116, %117 : vector<8x128xf32>
    %119 = vector.extract_strided_slice %112 {offsets = [0, 128], sizes = [8, 128], strides = [1, 1]} : vector<8x512xf32> to vector<8x128xf32>
    %120 = arith.negf %119 : vector<8x128xf32>
    %121 = math.exp %120 : vector<8x128xf32>
    %cst_34 = arith.constant 1.000000e+00 : f32
    %122 = vector.broadcast %cst_34 : f32 to vector<8x128xf32>
    %123 = arith.addf %122, %121 : vector<8x128xf32>
    %124 = arith.divf %122, %123 : vector<8x128xf32>
    %125 = vector.extract_strided_slice %112 {offsets = [0, 256], sizes = [8, 128], strides = [1, 1]} : vector<8x512xf32> to vector<8x128xf32>
    %126 = math.tanh %125 : vector<8x128xf32>
    %127 = vector.extract_strided_slice %112 {offsets = [0, 384], sizes = [8, 128], strides = [1, 1]} : vector<8x512xf32> to vector<8x128xf32>
    %128 = arith.negf %127 : vector<8x128xf32>
    %129 = math.exp %128 : vector<8x128xf32>
    %cst_35 = arith.constant 1.000000e+00 : f32
    %130 = vector.broadcast %cst_35 : f32 to vector<8x128xf32>
    %131 = arith.addf %130, %129 : vector<8x128xf32>
    %132 = arith.divf %130, %131 : vector<8x128xf32>
    %133 = arith.mulf %124, %101 : vector<8x128xf32>
    %134 = arith.mulf %118, %126 : vector<8x128xf32>
    %135 = arith.addf %133, %134 : vector<8x128xf32>
    %136 = math.tanh %135 : vector<8x128xf32>
    %137 = arith.mulf %132, %136 : vector<8x128xf32>
    %138 = arith.index_cast %c3_i32 : i32 to index
    %c0_36 = arith.constant 0 : index
    %c0_37 = arith.constant 0 : index
    %139 = vector.load %arg4[%138, %c0_36, %c0_37] : memref<8x8x128xf32, #tpu.memory_space<vmem>>, vector<1x8x128xf32>
    %140 = vector.shape_cast %139 : vector<1x8x128xf32> to vector<8x128xf32>
    %141 = vector.shape_cast %137 : vector<8x128xf32> to vector<1x8x128xf32>
    tpu.vector_store %arg4[%138, %c0_36, %c0_37], %141 {strides = array<i32>} : memref<8x8x128xf32, #tpu.memory_space<vmem>>, vector<1x8x128xf32>,
    %c4_i32 = arith.constant 4 : i32
    %142 = arith.index_cast %c4_i32 : i32 to index
    %c0_38 = arith.constant 0 : index
    %c0_39 = arith.constant 0 : index
    %143 = vector.load %arg2[%142, %c0_38, %c0_39] : memref<8x8x512xf32, #tpu.memory_space<vmem>>, vector<1x8x512xf32>
    %144 = vector.shape_cast %143 : vector<1x8x512xf32> to vector<8x512xf32>
    %cst_40 = arith.constant dense<0.000000e+00> : vector<8x512xf32>
    %145 = tpu.matmul %137, %3, %cst_40 {dimension_numbers = #tpu.dot_dimension_numbers<[1], [0], [0], [1], [0, 0, 1, 1], [], []>} : vector<8x128xf32>, vector<128x512xf32>, vector<8x512xf32> -> vector<8x512xf32>
    %146 = arith.addf %144, %145 : vector<8x512xf32>
    %147 = vector.extract_strided_slice %146 {offsets = [0, 0], sizes = [8, 128], strides = [1, 1]} : vector<8x512xf32> to vector<8x128xf32>
    %148 = arith.negf %147 : vector<8x128xf32>
    %149 = math.exp %148 : vector<8x128xf32>
    %cst_41 = arith.constant 1.000000e+00 : f32
    %150 = vector.broadcast %cst_41 : f32 to vector<8x128xf32>
    %151 = arith.addf %150, %149 : vector<8x128xf32>
    %152 = arith.divf %150, %151 : vector<8x128xf32>
    %153 = vector.extract_strided_slice %146 {offsets = [0, 128], sizes = [8, 128], strides = [1, 1]} : vector<8x512xf32> to vector<8x128xf32>
    %154 = arith.negf %153 : vector<8x128xf32>
    %155 = math.exp %154 : vector<8x128xf32>
    %cst_42 = arith.constant 1.000000e+00 : f32
    %156 = vector.broadcast %cst_42 : f32 to vector<8x128xf32>
    %157 = arith.addf %156, %155 : vector<8x128xf32>
    %158 = arith.divf %156, %157 : vector<8x128xf32>
    %159 = vector.extract_strided_slice %146 {offsets = [0, 256], sizes = [8, 128], strides = [1, 1]} : vector<8x512xf32> to vector<8x128xf32>
    %160 = math.tanh %159 : vector<8x128xf32>
    %161 = vector.extract_strided_slice %146 {offsets = [0, 384], sizes = [8, 128], strides = [1, 1]} : vector<8x512xf32> to vector<8x128xf32>
    %162 = arith.negf %161 : vector<8x128xf32>
    %163 = math.exp %162 : vector<8x128xf32>
    %cst_43 = arith.constant 1.000000e+00 : f32
    %164 = vector.broadcast %cst_43 : f32 to vector<8x128xf32>
    %165 = arith.addf %164, %163 : vector<8x128xf32>
    %166 = arith.divf %164, %165 : vector<8x128xf32>
    %167 = arith.mulf %158, %135 : vector<8x128xf32>
    %168 = arith.mulf %152, %160 : vector<8x128xf32>
    %169 = arith.addf %167, %168 : vector<8x128xf32>
    %170 = math.tanh %169 : vector<8x128xf32>
    %171 = arith.mulf %166, %170 : vector<8x128xf32>
    %172 = arith.index_cast %c4_i32 : i32 to index
    %c0_44 = arith.constant 0 : index
    %c0_45 = arith.constant 0 : index
    %173 = vector.load %arg4[%172, %c0_44, %c0_45] : memref<8x8x128xf32, #tpu.memory_space<vmem>>, vector<1x8x128xf32>
    %174 = vector.shape_cast %173 : vector<1x8x128xf32> to vector<8x128xf32>
    %175 = vector.shape_cast %171 : vector<8x128xf32> to vector<1x8x128xf32>
    tpu.vector_store %arg4[%172, %c0_44, %c0_45], %175 {strides = array<i32>} : memref<8x8x128xf32, #tpu.memory_space<vmem>>, vector<1x8x128xf32>,
    %c5_i32 = arith.constant 5 : i32
    %176 = arith.index_cast %c5_i32 : i32 to index
    %c0_46 = arith.constant 0 : index
    %c0_47 = arith.constant 0 : index
    %177 = vector.load %arg2[%176, %c0_46, %c0_47] : memref<8x8x512xf32, #tpu.memory_space<vmem>>, vector<1x8x512xf32>
    %178 = vector.shape_cast %177 : vector<1x8x512xf32> to vector<8x512xf32>
    %cst_48 = arith.constant dense<0.000000e+00> : vector<8x512xf32>
    %179 = tpu.matmul %171, %3, %cst_48 {dimension_numbers = #tpu.dot_dimension_numbers<[1], [0], [0], [1], [0, 0, 1, 1], [], []>} : vector<8x128xf32>, vector<128x512xf32>, vector<8x512xf32> -> vector<8x512xf32>
    %180 = arith.addf %178, %179 : vector<8x512xf32>
    %181 = vector.extract_strided_slice %180 {offsets = [0, 0], sizes = [8, 128], strides = [1, 1]} : vector<8x512xf32> to vector<8x128xf32>
    %182 = arith.negf %181 : vector<8x128xf32>
    %183 = math.exp %182 : vector<8x128xf32>
    %cst_49 = arith.constant 1.000000e+00 : f32
    %184 = vector.broadcast %cst_49 : f32 to vector<8x128xf32>
    %185 = arith.addf %184, %183 : vector<8x128xf32>
    %186 = arith.divf %184, %185 : vector<8x128xf32>
    %187 = vector.extract_strided_slice %180 {offsets = [0, 128], sizes = [8, 128], strides = [1, 1]} : vector<8x512xf32> to vector<8x128xf32>
    %188 = arith.negf %187 : vector<8x128xf32>
    %189 = math.exp %188 : vector<8x128xf32>
    %cst_50 = arith.constant 1.000000e+00 : f32
    %190 = vector.broadcast %cst_50 : f32 to vector<8x128xf32>
    %191 = arith.addf %190, %189 : vector<8x128xf32>
    %192 = arith.divf %190, %191 : vector<8x128xf32>
    %193 = vector.extract_strided_slice %180 {offsets = [0, 256], sizes = [8, 128], strides = [1, 1]} : vector<8x512xf32> to vector<8x128xf32>
    %194 = math.tanh %193 : vector<8x128xf32>
    %195 = vector.extract_strided_slice %180 {offsets = [0, 384], sizes = [8, 128], strides = [1, 1]} : vector<8x512xf32> to vector<8x128xf32>
    %196 = arith.negf %195 : vector<8x128xf32>
    %197 = math.exp %196 : vector<8x128xf32>
    %cst_51 = arith.constant 1.000000e+00 : f32
    %198 = vector.broadcast %cst_51 : f32 to vector<8x128xf32>
    %199 = arith.addf %198, %197 : vector<8x128xf32>
    %200 = arith.divf %198, %199 : vector<8x128xf32>
    %201 = arith.mulf %192, %169 : vector<8x128xf32>
    %202 = arith.mulf %186, %194 : vector<8x128xf32>
    %203 = arith.addf %201, %202 : vector<8x128xf32>
    %204 = math.tanh %203 : vector<8x128xf32>
    %205 = arith.mulf %200, %204 : vector<8x128xf32>
    %206 = arith.index_cast %c5_i32 : i32 to index
    %c0_52 = arith.constant 0 : index
    %c0_53 = arith.constant 0 : index
    %207 = vector.load %arg4[%206, %c0_52, %c0_53] : memref<8x8x128xf32, #tpu.memory_space<vmem>>, vector<1x8x128xf32>
    %208 = vector.shape_cast %207 : vector<1x8x128xf32> to vector<8x128xf32>
    %209 = vector.shape_cast %205 : vector<8x128xf32> to vector<1x8x128xf32>
    tpu.vector_store %arg4[%206, %c0_52, %c0_53], %209 {strides = array<i32>} : memref<8x8x128xf32, #tpu.memory_space<vmem>>, vector<1x8x128xf32>,
    %c6_i32 = arith.constant 6 : i32
    %210 = arith.index_cast %c6_i32 : i32 to index
    %c0_54 = arith.constant 0 : index
    %c0_55 = arith.constant 0 : index
    %211 = vector.load %arg2[%210, %c0_54, %c0_55] : memref<8x8x512xf32, #tpu.memory_space<vmem>>, vector<1x8x512xf32>
    %212 = vector.shape_cast %211 : vector<1x8x512xf32> to vector<8x512xf32>
    %cst_56 = arith.constant dense<0.000000e+00> : vector<8x512xf32>
    %213 = tpu.matmul %205, %3, %cst_56 {dimension_numbers = #tpu.dot_dimension_numbers<[1], [0], [0], [1], [0, 0, 1, 1], [], []>} : vector<8x128xf32>, vector<128x512xf32>, vector<8x512xf32> -> vector<8x512xf32>
    %214 = arith.addf %212, %213 : vector<8x512xf32>
    %215 = vector.extract_strided_slice %214 {offsets = [0, 0], sizes = [8, 128], strides = [1, 1]} : vector<8x512xf32> to vector<8x128xf32>
    %216 = arith.negf %215 : vector<8x128xf32>
    %217 = math.exp %216 : vector<8x128xf32>
    %cst_57 = arith.constant 1.000000e+00 : f32
    %218 = vector.broadcast %cst_57 : f32 to vector<8x128xf32>
    %219 = arith.addf %218, %217 : vector<8x128xf32>
    %220 = arith.divf %218, %219 : vector<8x128xf32>
    %221 = vector.extract_strided_slice %214 {offsets = [0, 128], sizes = [8, 128], strides = [1, 1]} : vector<8x512xf32> to vector<8x128xf32>
    %222 = arith.negf %221 : vector<8x128xf32>
    %223 = math.exp %222 : vector<8x128xf32>
    %cst_58 = arith.constant 1.000000e+00 : f32
    %224 = vector.broadcast %cst_58 : f32 to vector<8x128xf32>
    %225 = arith.addf %224, %223 : vector<8x128xf32>
    %226 = arith.divf %224, %225 : vector<8x128xf32>
    %227 = vector.extract_strided_slice %214 {offsets = [0, 256], sizes = [8, 128], strides = [1, 1]} : vector<8x512xf32> to vector<8x128xf32>
    %228 = math.tanh %227 : vector<8x128xf32>
    %229 = vector.extract_strided_slice %214 {offsets = [0, 384], sizes = [8, 128], strides = [1, 1]} : vector<8x512xf32> to vector<8x128xf32>
    %230 = arith.negf %229 : vector<8x128xf32>
    %231 = math.exp %230 : vector<8x128xf32>
    %cst_59 = arith.constant 1.000000e+00 : f32
    %232 = vector.broadcast %cst_59 : f32 to vector<8x128xf32>
    %233 = arith.addf %232, %231 : vector<8x128xf32>
    %234 = arith.divf %232, %233 : vector<8x128xf32>
    %235 = arith.mulf %226, %203 : vector<8x128xf32>
    %236 = arith.mulf %220, %228 : vector<8x128xf32>
    %237 = arith.addf %235, %236 : vector<8x128xf32>
    %238 = math.tanh %237 : vector<8x128xf32>
    %239 = arith.mulf %234, %238 : vector<8x128xf32>
    %240 = arith.index_cast %c6_i32 : i32 to index
    %c0_60 = arith.constant 0 : index
    %c0_61 = arith.constant 0 : index
    %241 = vector.load %arg4[%240, %c0_60, %c0_61] : memref<8x8x128xf32, #tpu.memory_space<vmem>>, vector<1x8x128xf32>
    %242 = vector.shape_cast %241 : vector<1x8x128xf32> to vector<8x128xf32>
    %243 = vector.shape_cast %239 : vector<8x128xf32> to vector<1x8x128xf32>
    tpu.vector_store %arg4[%240, %c0_60, %c0_61], %243 {strides = array<i32>} : memref<8x8x128xf32, #tpu.memory_space<vmem>>, vector<1x8x128xf32>,
    %c7_i32 = arith.constant 7 : i32
    %244 = arith.index_cast %c7_i32 : i32 to index
    %c0_62 = arith.constant 0 : index
    %c0_63 = arith.constant 0 : index
    %245 = vector.load %arg2[%244, %c0_62, %c0_63] : memref<8x8x512xf32, #tpu.memory_space<vmem>>, vector<1x8x512xf32>
    %246 = vector.shape_cast %245 : vector<1x8x512xf32> to vector<8x512xf32>
    %cst_64 = arith.constant dense<0.000000e+00> : vector<8x512xf32>
    %247 = tpu.matmul %239, %3, %cst_64 {dimension_numbers = #tpu.dot_dimension_numbers<[1], [0], [0], [1], [0, 0, 1, 1], [], []>} : vector<8x128xf32>, vector<128x512xf32>, vector<8x512xf32> -> vector<8x512xf32>
    %248 = arith.addf %246, %247 : vector<8x512xf32>
    %249 = vector.extract_strided_slice %248 {offsets = [0, 0], sizes = [8, 128], strides = [1, 1]} : vector<8x512xf32> to vector<8x128xf32>
    %250 = arith.negf %249 : vector<8x128xf32>
    %251 = math.exp %250 : vector<8x128xf32>
    %cst_65 = arith.constant 1.000000e+00 : f32
    %252 = vector.broadcast %cst_65 : f32 to vector<8x128xf32>
    %253 = arith.addf %252, %251 : vector<8x128xf32>
    %254 = arith.divf %252, %253 : vector<8x128xf32>
    %255 = vector.extract_strided_slice %248 {offsets = [0, 128], sizes = [8, 128], strides = [1, 1]} : vector<8x512xf32> to vector<8x128xf32>
    %256 = arith.negf %255 : vector<8x128xf32>
    %257 = math.exp %256 : vector<8x128xf32>
    %cst_66 = arith.constant 1.000000e+00 : f32
    %258 = vector.broadcast %cst_66 : f32 to vector<8x128xf32>
    %259 = arith.addf %258, %257 : vector<8x128xf32>
    %260 = arith.divf %258, %259 : vector<8x128xf32>
    %261 = vector.extract_strided_slice %248 {offsets = [0, 256], sizes = [8, 128], strides = [1, 1]} : vector<8x512xf32> to vector<8x128xf32>
    %262 = math.tanh %261 : vector<8x128xf32>
    %263 = vector.extract_strided_slice %248 {offsets = [0, 384], sizes = [8, 128], strides = [1, 1]} : vector<8x512xf32> to vector<8x128xf32>
    %264 = arith.negf %263 : vector<8x128xf32>
    %265 = math.exp %264 : vector<8x128xf32>
    %cst_67 = arith.constant 1.000000e+00 : f32
    %266 = vector.broadcast %cst_67 : f32 to vector<8x128xf32>
    %267 = arith.addf %266, %265 : vector<8x128xf32>
    %268 = arith.divf %266, %267 : vector<8x128xf32>
    %269 = arith.mulf %260, %237 : vector<8x128xf32>
    %270 = arith.mulf %254, %262 : vector<8x128xf32>
    %271 = arith.addf %269, %270 : vector<8x128xf32>
    %272 = math.tanh %271 : vector<8x128xf32>
    %273 = arith.mulf %268, %272 : vector<8x128xf32>
    %274 = arith.index_cast %c7_i32 : i32 to index
    %c0_68 = arith.constant 0 : index
    %c0_69 = arith.constant 0 : index
    %275 = vector.load %arg4[%274, %c0_68, %c0_69] : memref<8x8x128xf32, #tpu.memory_space<vmem>>, vector<1x8x128xf32>
    %276 = vector.shape_cast %275 : vector<1x8x128xf32> to vector<8x128xf32>
    %277 = vector.shape_cast %273 : vector<8x128xf32> to vector<1x8x128xf32>
    tpu.vector_store %arg4[%274, %c0_68, %c0_69], %277 {strides = array<i32>} : memref<8x8x128xf32, #tpu.memory_space<vmem>>, vector<1x8x128xf32>,
    %c8_i32 = arith.constant 8 : i32
    %c0_70 = arith.constant 0 : index
    %c0_71 = arith.constant 0 : index
    %278 = vector.load %arg5[%c0_70, %c0_71] : memref<8x128xf32, #tpu.memory_space<vmem>>, vector<8x128xf32>
    tpu.vector_store %arg5[%c0_70, %c0_71], %273 {strides = array<i32>} : memref<8x128xf32, #tpu.memory_space<vmem>>, vector<8x128xf32>,
    %c0_72 = arith.constant 0 : index
    %c0_73 = arith.constant 0 : index
    %279 = vector.load %arg6[%c0_72, %c0_73] : memref<8x128xf32, #tpu.memory_space<vmem>>, vector<8x128xf32>
    tpu.vector_store %arg6[%c0_72, %c0_73], %271 {strides = array<i32>} : memref<8x128xf32, #tpu.memory_space<vmem>>, vector<8x128xf32>,
    return
  }
  func.func @transform_0(%arg0: i32, %arg1: i32) -> (i32, i32, i32) {
    %c0_i32 = arith.constant 0 : i32
    %c0_i32_0 = arith.constant 0 : i32
    return %arg1, %arg0, %c0_i32 : i32, i32, i32
  }
  func.func @transform_1(%arg0: i32, %arg1: i32) -> (i32, i32) {
    %c0_i32 = arith.constant 0 : i32
    %c0_i32_0 = arith.constant 0 : i32
    %c0_i32_1 = arith.constant 0 : i32
    return %c0_i32, %c0_i32_0 : i32, i32
  }
  func.func @transform_2(%arg0: i32, %arg1: i32) -> (i32, i32, i32) {
    %c0_i32 = arith.constant 0 : i32
    %c0_i32_0 = arith.constant 0 : i32
    return %arg1, %arg0, %c0_i32 : i32, i32, i32
  }
}

</mosaic_0001>

<bundles_post_ra>
// kernel: tpu_custom_call.1
= control target key start
LH: loop header
LB: loop body
LE: loop exit
PB: predicated region body
PF: predicated region fallthrough
CT: control target
= control target key end

     0   :  { %7 = vsyncpa [#allocation5], 0  ;;  %s2678_s0 = inlined_call_operand.hbm [shape: f32[8,8,512], index: 0, kind: input, shape index: {}]   ;;  %s2679_s1 = inlined_call_operand.hbm [shape: f32[128,512], index: 1, kind: input, shape index: {}]   ;;  %s2680_s2 = inlined_call_operand.hbm [shape: f32[8,8,128], index: 2, kind: output, shape index: {}]  }
   0x1   :  { %8 = vsyncpa [#allocation8], 0 }
   0x2   :  { %9 = vsyncpa [#allocation6], 0  ;;  %s1836_s9 = smov [#allocation4]  }
   0x3   :  { %s15_s10 = sshll.u32 %s1836_s9, 4  ;;  %s16_s10 = int_to_ptr.vmem [resolvable:$true] %s15_s10 }
   0x4   :  { %s1778_s11 = scalar_lea.vmem %s16_s10, 4096  ;;  %p1783_p1 = scmp.lt.s32.totalorder %s16_s10, %s16_s10 }
   0x5   :  { %p1779_p0 = scmp.ne.s32.totalorder %s16_s10, %s1778_s11  ;;  %p1784_p2 = scmp.lt.s32.totalorder %s1778_s11, %s1778_s11 }
   0x7   :  { %p1785_p3 = por %p1784_p2, %p1783_p1 }
   0x9   :  { %p1786_p4 = pnand %p1785_p3, %p1779_p0 }
   0xb   :  { %1789 = shalt.err (!%p1786_p4)
}
   0xc   :  { %s1837_s12 = smov 512   ;;  %s1838_s13 = smov 32  }
   0xd   :  { %21 = dma.hbm_to_vmem [thread:$0]  %s2678_s0, 4096, %s16_s10, [#allocation5], %s1837_s12, %s1837_s12, %s1838_s13  }
   0xe   :  { %s1839_s16 = smov [#allocation7]  }
   0xf   :  { %s27_s17 = sshll.u32 %s1839_s16, 4  ;;  %s28_s17 = int_to_ptr.vmem [resolvable:$true] %s27_s17 }
  0x10   :  { %s1798_s18 = scalar_lea.vmem %s28_s17, 8192  ;;  %p1803_p6 = scmp.lt.s32.totalorder %s28_s17, %s28_s17 }
  0x11   :  { %p1799_p5 = scmp.ne.s32.totalorder %s28_s17, %s1798_s18  ;;  %p1804_p7 = scmp.lt.s32.totalorder %s1798_s18, %s1798_s18 }
  0x13   :  { %p1805_p8 = por %p1804_p7, %p1803_p6 }
  0x15   :  { %p1806_p9 = pnand %p1805_p8, %p1799_p5 }
  0x17   :  { %1809 = shalt.err (!%p1806_p9)
}
  0x18   :  { %33 = dma.hbm_to_vmem [thread:$0]  %s2679_s1, 8192, %s28_s17, [#allocation8], %s1837_s12, %s1837_s12, %s1838_s13  }
  0x19   :  { %1830 = dma.done.wait [#allocation5], 4096  }
  0x1a   :  { %1831 = vsyncadd [#allocation5], 4294963200 }
  0x1b   :  { %1832 = dma.done.wait [#allocation8], 8192  }
  0x1c   :  { %1833 = vsyncadd [#allocation8], 4294959104  ;;  %v2683_v0 = vmov 0.0   ;;  %v1867_v1 = vld [vmem:[#allocation7 + $0x1e8] sm:$0xff]  ;;  %v1869_v2 = vld [vmem:[#allocation7 + $0x1e0] sm:$0xff]  ;;  %s1841_s0 = smov [#allocation9]  }
  0x1d   :  { %180 = vmatprep.mubr.f32.mxu0 %v2683_v0  ;;  %251 = vmatprep.mubr.f32.mxu1 %v2683_v0  ;;  %2754 = vst [vmem:[#allocation13_spill] sm:$0xff] %v1867_v1  ;;  %v1871_v3 = vld [vmem:[#allocation7 + $0x1c8] sm:$0xff]  ;;  %v1874_v4 = vld [vmem:[#allocation7 + $0x1c0] sm:$0xff]  ;;  %v1888_v9 = vld [vmem:[#allocation7 + $0x1f8] sm:$0xff]  ;;  %s1533_s1 = sshll.u32 %s1841_s0, 4  ;;  %s1534_s1 = int_to_ptr.vmem [resolvable:$true] %s1533_s1 }
  0x1e   :  { %116 = vmatprep.subr.mxu0 %v1867_v1  ;;  %v1877_v5 = vld [vmem:[#allocation7 + $0x1a8] sm:$0xff]  ;;  %v1880_v6 = vld [vmem:[#allocation7 + $0x1a0] sm:$0xff]  ;;  %2755 = vst [vmem:[#allocation14_spill] sm:$0xff] %v1888_v9  ;;  %187 = vmatprep.subr.mxu1 %v1888_v9  ;;  %v1894_v11 = vld [vmem:[#allocation7 + $0x1f0] sm:$0xff]  ;;  %s1810_s21 = scalar_lea.vmem %s1534_s1, 1024  ;;  %p1815_p11 = scmp.lt.s32.totalorder %s1534_s1, %s1534_s1 }
  0x1f   :  { %117 = vmatpush1.msra.mxu0 %v1869_v2  ;;  %v1883_v7 = vld [vmem:[#allocation7 + $0x188] sm:$0xff]  ;;  %v1886_v8 = vld [vmem:[#allocation7 + $0x180] sm:$0xff]  ;;  %188 = vmatpush1.msra.mxu1 %v1894_v11  ;;  %v1900_v13 = vld [vmem:[#allocation7 + $0x1d8] sm:$0xff]  ;;  %p1811_p10 = scmp.ne.s32.totalorder %s1534_s1, %s1810_s21  ;;  %p1816_p12 = scmp.lt.s32.totalorder %s1810_s21, %s1810_s21 }
  0x20   :  { %118 = vmatprep.subr.mxu0 %v1871_v3  ;;  %v1891_v10 = vld [vmem:[#allocation7 + $0x168] sm:$0xff]  ;;  %v1897_v12 = vld [vmem:[#allocation7 + $0x160] sm:$0xff]  ;;  %v1902_v14 = vld [vmem:[#allocation7 + $0x1d0] sm:$0xff]  ;;  %189 = vmatprep.subr.mxu1 %v1900_v13 }
  0x21   :  { %119 = vmatpush1.msra.mxu0 %v1874_v4  ;;  %v1905_v15 = vld [vmem:[#allocation7 + $0x148] sm:$0xff]  ;;  %v1908_v16 = vld [vmem:[#allocation7 + $0x1b8] sm:$0xff]  ;;  %v1911_v17 = vld [vmem:[#allocation7 + $0x140] sm:$0xff]  ;;  %190 = vmatpush1.msra.mxu1 %v1902_v14  ;;  %p1817_p13 = por %p1816_p12, %p1815_p11 }
  0x22   :  { %120 = vmatprep.subr.mxu0 %v1877_v5  ;;  %v1914_v18 = vld [vmem:[#allocation7 + $0x1b0] sm:$0xff]  ;;  %v1916_v19 = vld [vmem:[#allocation7 + $0x198] sm:$0xff]  ;;  %v1919_v20 = vld [vmem:[#allocation7 + $0x128] sm:$0xff]  ;;  %191 = vmatprep.subr.mxu1 %v1908_v16 }
  0x23   :  { %121 = vmatpush1.msra.mxu0 %v1880_v6  ;;  %v1922_v21 = vld [vmem:[#allocation7 + $0x190] sm:$0xff]  ;;  %v1925_v22 = vld [vmem:[#allocation7 + $0x120] sm:$0xff]  ;;  %192 = vmatpush1.msra.mxu1 %v1914_v18  ;;  %v1928_v23 = vld [vmem:[#allocation7 + $0x178] sm:$0xff]  ;;  %p1818_p0 = pnand %p1817_p13, %p1811_p10 }
  0x24   :  { %122 = vmatprep.subr.mxu0 %v1883_v7  ;;  %v1931_v24 = vld [vmem:[#allocation7 + $0x108] sm:$0xff]  ;;  %193 = vmatprep.subr.mxu1 %v1916_v19  ;;  %v1934_v25 = vld [vmem:[#allocation7 + $0x170] sm:$0xff]  ;;  %v1937_v26 = vld [vmem:[#allocation7 + $0x100] sm:$0xff] }
  0x25   :  { %123 = vmatpush1.msra.mxu0 %v1886_v8  ;;  %194 = vmatpush1.msra.mxu1 %v1922_v21  ;;  %v1940_v27 = vld [vmem:[#allocation7 + $0x158] sm:$0xff]  ;;  %v1943_v28 = vld [vmem:[#allocation7 + $0xe8] sm:$0xff]  ;;  %v1946_v29 = vld [vmem:[#allocation7 + $0x150] sm:$0xff] }
  0x26   :  { %124 = vmatprep.subr.mxu0 %v1891_v10  ;;  %195 = vmatprep.subr.mxu1 %v1928_v23  ;;  %v1949_v30 = vld [vmem:[#allocation7 + $0xe0] sm:$0xff]  ;;  %v1952_v31 = vld [vmem:[#allocation7 + $0x138] sm:$0xff]  ;;  %v1955_v32 = vld [vmem:[#allocation7 + $0xc8] sm:$0xff] }
  0x27   :  { %125 = vmatpush1.msra.mxu0 %v1897_v12  ;;  %196 = vmatpush1.msra.mxu1 %v1934_v25  ;;  %v1958_v33 = vld [vmem:[#allocation7 + $0x130] sm:$0xff]  ;;  %v1961_v34 = vld [vmem:[#allocation7 + $0xc0] sm:$0xff]  ;;  %v1964_v35 = vld [vmem:[#allocation7 + $0x118] sm:$0xff] }
  0x28   :  { %126 = vmatprep.subr.mxu0 %v1905_v15  ;;  %197 = vmatprep.subr.mxu1 %v1940_v27  ;;  %v1967_v36 = vld [vmem:[#allocation7 + $0xa8] sm:$0xff]  ;;  %v1970_v37 = vld [vmem:[#allocation7 + $0x110] sm:$0xff]  ;;  %v1973_v38 = vld [vmem:[#allocation7 + $0xa0] sm:$0xff] }
  0x29   :  { %127 = vmatpush1.msra.mxu0 %v1911_v17  ;;  %198 = vmatpush1.msra.mxu1 %v1946_v29  ;;  %v1976_v39 = vld [vmem:[#allocation7 + $0xf8] sm:$0xff]  ;;  %v1979_v40 = vld [vmem:[#allocation7 + $0x88] sm:$0xff]  ;;  %v1982_v41 = vld [vmem:[#allocation7 + $0xf0] sm:$0xff] }
  0x2a   :  { %128 = vmatprep.subr.mxu0 %v1919_v20  ;;  %199 = vmatprep.subr.mxu1 %v1952_v31  ;;  %v1985_v42 = vld [vmem:[#allocation7 + $0x80] sm:$0xff]  ;;  %v1988_v43 = vld [vmem:[#allocation7 + $0xd8] sm:$0xff]  ;;  %v1991_v44 = vld [vmem:[#allocation7 + $0x68] sm:$0xff] }
  0x2b   :  { %129 = vmatpush1.msra.mxu0 %v1925_v22  ;;  %200 = vmatpush1.msra.mxu1 %v1958_v33  ;;  %2756 = vst [vmem:[#allocation15_spill] sm:$0xff] %v1985_v42  ;;  %2757 = vst [vmem:[#allocation16_spill] sm:$0xff] %v1991_v44  ;;  %v1994_v45 = vld [vmem:[#allocation7 + $0xd0] sm:$0xff]  ;;  %v1997_v46 = vld [vmem:[#allocation7 + $0x60] sm:$0xff] }
  0x2c   :  { %130 = vmatprep.subr.mxu0 %v1931_v24  ;;  %201 = vmatprep.subr.mxu1 %v1964_v35  ;;  %2758 = vst [vmem:[#allocation17_spill] sm:$0xff] %v1997_v46  ;;  %v2000_v47 = vld [vmem:[#allocation7 + $0xb8] sm:$0xff]  ;;  %v2003_v48 = vld [vmem:[#allocation7 + $0x48] sm:$0xff]  ;;  %v2006_v49 = vld [vmem:[#allocation7 + $0xb0] sm:$0xff] }
  0x2d   :  { %131 = vmatpush1.msra.mxu0 %v1937_v26  ;;  %202 = vmatpush1.msra.mxu1 %v1970_v37  ;;  %2759 = vst [vmem:[#allocation18_spill] sm:$0xff] %v2003_v48  ;;  %v2009_v50 = vld [vmem:[#allocation7 + $0x40] sm:$0xff]  ;;  %v2012_v51 = vld [vmem:[#allocation7 + $0x98] sm:$0xff]  ;;  %v2015_v52 = vld [vmem:[#allocation7 + $0x28] sm:$0xff] }
  0x2e   :  { %132 = vmatprep.subr.mxu0 %v1943_v28  ;;  %203 = vmatprep.subr.mxu1 %v1976_v39  ;;  %2760 = vst [vmem:[#allocation19_spill] sm:$0xff] %v2009_v50  ;;  %2761 = vst [vmem:[#allocation20_spill] sm:$0xff] %v2015_v52  ;;  %v2018_v53 = vld [vmem:[#allocation7 + $0x90] sm:$0xff]  ;;  %v2021_v54 = vld [vmem:[#allocation7 + $0x20] sm:$0xff] }
  0x2f   :  { %133 = vmatpush1.msra.mxu0 %v1949_v30  ;;  %204 = vmatpush1.msra.mxu1 %v1982_v41  ;;  %2762 = vst [vmem:[#allocation21_spill] sm:$0xff] %v2018_v53  ;;  %2763 = vst [vmem:[#allocation22_spill] sm:$0xff] %v2021_v54  ;;  %v2024_v55 = vld [vmem:[#allocation7 + $0x78] sm:$0xff]  ;;  %v2027_v56 = vld [vmem:[#allocation7 + $0x8] sm:$0xff] }
  0x30   :  { %134 = vmatprep.subr.mxu0 %v1955_v32  ;;  %205 = vmatprep.subr.mxu1 %v1988_v43  ;;  %2764 = vst [vmem:[#allocation23_spill] sm:$0xff] %v2024_v55  ;;  %2765 = vst [vmem:[#allocation24_spill] sm:$0xff] %v2027_v56  ;;  %v2030_v57 = vld [vmem:[#allocation7 + $0x70] sm:$0xff]  ;;  %v2033_v58 = vld [vmem:[#allocation7] sm:$0xff] }
  0x31   :  { %135 = vmatpush1.msra.mxu0 %v1961_v34  ;;  %206 = vmatpush1.msra.mxu1 %v1994_v45  ;;  %2766 = vst [vmem:[#allocation25_spill] sm:$0xff] %v2030_v57  ;;  %2767 = vst [vmem:[#allocation26_spill] sm:$0xff] %v2033_v58  ;;  %v2036_v59 = vld [vmem:[#allocation7 + $0x58] sm:$0xff]  ;;  %v2040_v60 = vld [vmem:[#allocation7 + $0x50] sm:$0xff] }
  0x32   :  { %136 = vmatprep.subr.mxu0 %v1967_v36  ;;  %207 = vmatprep.subr.mxu1 %v2000_v47  ;;  %2768 = vst [vmem:[#allocation27_spill] sm:$0xff] %v2036_v59  ;;  %2769 = vst [vmem:[#allocation28_spill] sm:$0xff] %v2040_v60  ;;  %v2044_v61 = vld [vmem:[#allocation7 + $0x38] sm:$0xff]  ;;  %v2048_v62 = vld [vmem:[#allocation7 + $0x30] sm:$0xff] }
  0x33   :  { %137 = vmatpush1.msra.mxu0 %v1973_v38  ;;  %208 = vmatpush1.msra.mxu1 %v2006_v49  ;;  %2770 = vst [vmem:[#allocation29_spill] sm:$0xff] %v2044_v61  ;;  %2771 = vst [vmem:[#allocation30_spill] sm:$0xff] %v2048_v62  ;;  %v2052_v63 = vld [vmem:[#allocation7 + $0x18] sm:$0xff] }
  0x34   :  { %138 = vmatprep.subr.mxu0 %v1979_v40  ;;  %209 = vmatprep.subr.mxu1 %v2012_v51  ;;  %2772 = vst [vmem:[#allocation31_spill] sm:$0xff] %v2052_v63 }
  0x35   :  { %139 = vmatpush1.msra.mxu0 %v1985_v42  ;;  %210 = vmatpush1.msra.mxu1 %v2018_v53 }
  0x36   :  { %140 = vmatprep.subr.mxu0 %v1991_v44  ;;  %211 = vmatprep.subr.mxu1 %v2024_v55 }
  0x37   :  { %141 = vmatpush1.msra.mxu0 %v1997_v46  ;;  %212 = vmatpush1.msra.mxu1 %v2030_v57 }
  0x38   :  { %142 = vmatprep.subr.mxu0 %v2003_v48  ;;  %213 = vmatprep.subr.mxu1 %v2036_v59 }
  0x39   :  { %143 = vmatpush1.msra.mxu0 %v2009_v50  ;;  %214 = vmatpush1.msra.mxu1 %v2040_v60 }
  0x3a   :  { %144 = vmatprep.subr.mxu0 %v2015_v52  ;;  %215 = vmatprep.subr.mxu1 %v2044_v61 }
  0x3b   :  { %145 = vmatpush1.msra.mxu0 %v2021_v54  ;;  %v2055_v54 = vld [vmem:[#allocation7 + $0x10] sm:$0xff]  ;;  %216 = vmatpush1.msra.mxu1 %v2048_v62 }
  0x3c   :  { %146 = vmatprep.subr.mxu0 %v2027_v56  ;;  %2773 = vst [vmem:[#allocation32_spill] sm:$0xff] %v2055_v54  ;;  %217 = vmatprep.subr.mxu1 %v2052_v63 }
  0x3d   :  { %147 = vmatpush1.msra.mxu0 %v2033_v58  ;;  %218 = vmatpush1.msra.mxu1 %v2055_v54 }
  0x3e   :  { %181 = vmatmul.mubr.f32.vlgmr.msra.gmra.mxu0 %v2683_v0  ;;  %292 = vmatprep.subr.mxu0 %v1867_v1 }
  0x3f   :  { %293 = vmatpush1.msra.mxu0 %v1869_v2  ;;  %252 = vmatmul.mubr.f32.vlgmr.msra.gmra.mxu1 %v2683_v0  ;;  %v2774_v0 = vld [vmem:[#allocation22_spill] sm:$0xff] }
  0x40   :  { %294 = vmatprep.subr.mxu0 %v1871_v3  ;;  %363 = vmatprep.subr.mxu1 %v1888_v9 }
  0x41   :  { %295 = vmatpush1.msra.mxu0 %v1874_v4  ;;  %364 = vmatpush1.msra.mxu1 %v1894_v11 }
  0x42   :  { %296 = vmatprep.subr.mxu0 %v1877_v5  ;;  %365 = vmatprep.subr.mxu1 %v1900_v13 }
  0x43   :  { %297 = vmatpush1.msra.mxu0 %v1880_v6  ;;  %366 = vmatpush1.msra.mxu1 %v1902_v14 }
  0x44   :  { %298 = vmatprep.subr.mxu0 %v1883_v7  ;;  %367 = vmatprep.subr.mxu1 %v1908_v16 }
  0x45   :  { %299 = vmatpush1.msra.mxu0 %v1886_v8  ;;  %368 = vmatpush1.msra.mxu1 %v1914_v18 }
  0x46   :  { %300 = vmatprep.subr.mxu0 %v1891_v10  ;;  %369 = vmatprep.subr.mxu1 %v1916_v19 }
  0x47   :  { %301 = vmatpush1.msra.mxu0 %v1897_v12  ;;  %370 = vmatpush1.msra.mxu1 %v1922_v21 }
  0x48   :  { %302 = vmatprep.subr.mxu0 %v1905_v15  ;;  %371 = vmatprep.subr.mxu1 %v1928_v23 }
  0x49   :  { %303 = vmatpush1.msra.mxu0 %v1911_v17  ;;  %372 = vmatpush1.msra.mxu1 %v1934_v25 }
  0x4a   :  { %304 = vmatprep.subr.mxu0 %v1919_v20  ;;  %373 = vmatprep.subr.mxu1 %v1940_v27 }
  0x4b   :  { %305 = vmatpush1.msra.mxu0 %v1925_v22  ;;  %374 = vmatpush1.msra.mxu1 %v1946_v29 }
  0x4c   :  { %306 = vmatprep.subr.mxu0 %v1931_v24  ;;  %375 = vmatprep.subr.mxu1 %v1952_v31 }
  0x4d   :  { %307 = vmatpush1.msra.mxu0 %v1937_v26  ;;  %376 = vmatpush1.msra.mxu1 %v1958_v33 }
  0x4e   :  { %308 = vmatprep.subr.mxu0 %v1943_v28  ;;  %377 = vmatprep.subr.mxu1 %v1964_v35 }
  0x4f   :  { %309 = vmatpush1.msra.mxu0 %v1949_v30  ;;  %378 = vmatpush1.msra.mxu1 %v1970_v37 }
  0x50   :  { %310 = vmatprep.subr.mxu0 %v1955_v32  ;;  %379 = vmatprep.subr.mxu1 %v1976_v39 }
  0x51   :  { %311 = vmatpush1.msra.mxu0 %v1961_v34  ;;  %380 = vmatpush1.msra.mxu1 %v1982_v41 }
  0x52   :  { %312 = vmatprep.subr.mxu0 %v1967_v36  ;;  %381 = vmatprep.subr.mxu1 %v1988_v43 }
  0x53   :  { %313 = vmatpush1.msra.mxu0 %v1973_v38  ;;  %382 = vmatpush1.msra.mxu1 %v1994_v45 }
  0x54   :  { %314 = vmatprep.subr.mxu0 %v1979_v40  ;;  %383 = vmatprep.subr.mxu1 %v2000_v47 }
  0x55   :  { %315 = vmatpush1.msra.mxu0 %v1985_v42  ;;  %384 = vmatpush1.msra.mxu1 %v2006_v49 }
  0x56   :  { %316 = vmatprep.subr.mxu0 %v1991_v44  ;;  %385 = vmatprep.subr.mxu1 %v2012_v51 }
  0x57   :  { %317 = vmatpush1.msra.mxu0 %v1997_v46  ;;  %386 = vmatpush1.msra.mxu1 %v2018_v53 }
  0x58   :  { %318 = vmatprep.subr.mxu0 %v2003_v48  ;;  %387 = vmatprep.subr.mxu1 %v2024_v55  ;;  %v2775_v48 = vmov 0.0  }
  0x59   :  { %319 = vmatpush1.msra.mxu0 %v2009_v50  ;;  %388 = vmatpush1.msra.mxu1 %v2030_v57 }
  0x5a   :  { %320 = vmatprep.subr.mxu0 %v2015_v52  ;;  %389 = vmatprep.subr.mxu1 %v2036_v59  ;;  %v113_v52 = vld [vmem:[#allocation4 + $0x8] sm:$0xff] }
  0x5b   :  { %321 = vmatpush1.msra.mxu0 %v2774_v0  ;;  %390 = vmatpush1.msra.mxu1 %v2040_v60  ;;  %v112_v0 = vld [vmem:[#allocation4] sm:$0xff] }
  0x5c   :  { %322 = vmatprep.subr.mxu0 %v2027_v56  ;;  %391 = vmatprep.subr.mxu1 %v2044_v61 }
  0x5d   :  { %323 = vmatpush1.msra.mxu0 %v2033_v58  ;;  %392 = vmatpush1.msra.mxu1 %v2048_v62 }
  0x5e   :  { %356 = vmatprep.mubr.f32.mxu0 %v2775_v48  ;;  %393 = vmatprep.subr.mxu1 %v2052_v63  ;;  %v115_v63 = vld [vmem:[#allocation4 + $0x18] sm:$0xff] }
  0x5f   :  { %427 = vmatprep.mubr.f32.mxu1 %v2775_v48  ;;  %394 = vmatpush1.msra.mxu1 %v2055_v54  ;;  %v114_v48 = vld [vmem:[#allocation4 + $0x10] sm:$0xff] }
  0x60   :  { %469 = vmatprep.subr.mxu0 %v1867_v1  ;;  %540 = vmatprep.subr.mxu1 %v1888_v9 }
  0xfe   :  { %v182_v56 = vpop.f32.mrf.mxu0 }
  0xff   :  { %v258_v61 = vadd.f32 %v182_v56, %v112_v0  ;;  %v253_v59 = vpop.f32.mrf.mxu1 }
 0x100   :  { %v184_v60 = vpop.f32.mrf.mxu0  ;;  %v260_v54 = vadd.f32 %v253_v59, %v114_v48  ;;  %v2781_v59 = vld [vmem:[#allocation18_spill] sm:$0xff] }
 0x101   :  { %v1546_v58 = vmul.f32 -1.442695, %v258_v61  ;;  %v259_v50 = vadd.f32 %v184_v60, %v113_v52  ;;  %v255_v57 = vpop.f32.mrf.mxu1 }
 0x102   :  { %v261_v46 = vadd.f32 %v255_v57, %v115_v63  ;;  %v2780_v57 = vld [vmem:[#allocation25_spill] sm:$0xff]  ;;  %v2782_v63 = vld [vmem:[#allocation27_spill] sm:$0xff] }
 0x103   :  { %1578 = vpow2.f32 %v1546_v58  ;;  %v1547_v62 = vmul.f32 -1.442695, %v259_v50 }
 0x104   :  { %v1548_v55 = vmul.f32 -1.442695, %v261_v46 }
 0x105   :  { %1580 = vpow2.f32 %v1547_v62 }
 0x106   :  { %1582 = vtanh.f32 %v260_v54  ;;  %v2778_v54 = vld [vmem:[#allocation23_spill] sm:$0xff] }
 0x107   :  { %1584 = vpow2.f32 %v1548_v55  ;;  %v2779_v55 = vld [vmem:[#allocation17_spill] sm:$0xff] }
 0x110   :  { %v1579_v1 = vpop.eup %1578 }
 0x111   :  { %v265_v44 = vadd.f32 1.0, %v1579_v1 }
 0x112   :  { %v1581_v9 = vpop.eup %1580 }
 0x113   :  { %1586 = vrcp.f32 %v265_v44  ;;  %v271_v0 = vadd.f32 1.0, %v1581_v9  ;;  %v1583_v56 = vpop.eup %1582  ;;  %v2776_v9 = vld [vmem:[#allocation21_spill] sm:$0xff]  ;;  %v2777_v44 = vld [vmem:[#allocation16_spill] sm:$0xff] }
 0x114   :  { %v1585_v52 = vpop.eup %1584 }
 0x115   :  { %1588 = vrcp.f32 %v271_v0  ;;  %v278_v60 = vadd.f32 1.0, %v1585_v52  ;;  %v2783_v0 = vld [vmem:[#allocation19_spill] sm:$0xff]  ;;  %v2785_v52 = vld [vmem:[#allocation20_spill] sm:$0xff] }
 0x117   :  { %1590 = vrcp.f32 %v278_v60  ;;  %v2788_v60 = vld [vmem:[#allocation30_spill] sm:$0xff] }
 0x120   :  { %v1587_v58 = vpop.eup %1586 }
 0x121   :  { %v282_v62 = vmul.f32 %v1587_v58, %v1583_v56  ;;  %v2784_v56 = vld [vmem:[#allocation28_spill] sm:$0xff]  ;;  %v2786_v58 = vld [vmem:[#allocation29_spill] sm:$0xff] }
 0x122   :  { %v1589_v50 = vpop.eup %1588 }
 0x123   :  { %v281_v61 = vmul.f32 0.0, %v1589_v50  ;;  %v2787_v50 = vld [vmem:[#allocation22_spill] sm:$0xff] }
 0x124   :  { %v1591_v46 = vpop.eup %1590 }
 0x125   :  { %v2129_v53 = vadd.f32 %v282_v62, %v281_v61  ;;  %v2789_v61 = vld [vmem:[#allocation24_spill] sm:$0xff]  ;;  %v2790_v62 = vld [vmem:[#allocation31_spill] sm:$0xff] }
 0x127   :  { %1592 = vtanh.f32 %v2129_v53 }
 0x134   :  { %v1593_v1 = vpop.eup %1592 }
 0x135   :  { %v285_v48 = vmul.f32 %v1593_v1, %v1591_v46  ;;  %v2791_v46 = vld [vmem:[#allocation26_spill] sm:$0xff]  ;;  %v2792_v1 = vmov 0.0  }
 0x137   :  { %286 = vst [vmem:[#allocation9] sm:$0xff] %v285_v48  ;;  %357 = vmatmul.mubr.f32.vlgmr.msra.gmra.mxu0 %v285_v48  ;;  %428 = vmatmul.mubr.f32.vlgmr.msra.gmra.mxu1 %v285_v48  ;;  %v2793_v48 = vld [vmem:[#allocation32_spill] sm:$0xff] }
 0x138   :  { %470 = vmatpush1.msra.mxu0 %v1869_v2  ;;  %541 = vmatpush1.msra.mxu1 %v1894_v11 }
 0x139   :  { %471 = vmatprep.subr.mxu0 %v1871_v3  ;;  %542 = vmatprep.subr.mxu1 %v1900_v13 }
 0x13a   :  { %472 = vmatpush1.msra.mxu0 %v1874_v4  ;;  %543 = vmatpush1.msra.mxu1 %v1902_v14 }
 0x13b   :  { %473 = vmatprep.subr.mxu0 %v1877_v5  ;;  %544 = vmatprep.subr.mxu1 %v1908_v16 }
 0x13c   :  { %474 = vmatpush1.msra.mxu0 %v1880_v6  ;;  %545 = vmatpush1.msra.mxu1 %v1914_v18 }
 0x13d   :  { %475 = vmatprep.subr.mxu0 %v1883_v7  ;;  %546 = vmatprep.subr.mxu1 %v1916_v19 }
 0x13e   :  { %476 = vmatpush1.msra.mxu0 %v1886_v8  ;;  %547 = vmatpush1.msra.mxu1 %v1922_v21 }
 0x13f   :  { %477 = vmatprep.subr.mxu0 %v1891_v10  ;;  %548 = vmatprep.subr.mxu1 %v1928_v23 }
 0x140   :  { %478 = vmatpush1.msra.mxu0 %v1897_v12  ;;  %549 = vmatpush1.msra.mxu1 %v1934_v25 }
 0x141   :  { %479 = vmatprep.subr.mxu0 %v1905_v15  ;;  %550 = vmatprep.subr.mxu1 %v1940_v27 }
 0x142   :  { %480 = vmatpush1.msra.mxu0 %v1911_v17  ;;  %551 = vmatpush1.msra.mxu1 %v1946_v29 }
 0x143   :  { %481 = vmatprep.subr.mxu0 %v1919_v20  ;;  %552 = vmatprep.subr.mxu1 %v1952_v31 }
 0x144   :  { %482 = vmatpush1.msra.mxu0 %v1925_v22  ;;  %553 = vmatpush1.msra.mxu1 %v1958_v33 }
 0x145   :  { %483 = vmatprep.subr.mxu0 %v1931_v24  ;;  %554 = vmatprep.subr.mxu1 %v1964_v35 }
 0x146   :  { %484 = vmatpush1.msra.mxu0 %v1937_v26  ;;  %555 = vmatpush1.msra.mxu1 %v1970_v37 }
 0x147   :  { %485 = vmatprep.subr.mxu0 %v1943_v28  ;;  %556 = vmatprep.subr.mxu1 %v1976_v39 }
 0x148   :  { %486 = vmatpush1.msra.mxu0 %v1949_v30  ;;  %557 = vmatpush1.msra.mxu1 %v1982_v41 }
 0x149   :  { %487 = vmatprep.subr.mxu0 %v1955_v32  ;;  %558 = vmatprep.subr.mxu1 %v1988_v43 }
 0x14a   :  { %488 = vmatpush1.msra.mxu0 %v1961_v34  ;;  %559 = vmatpush1.msra.mxu1 %v1994_v45 }
 0x14b   :  { %489 = vmatprep.subr.mxu0 %v1967_v36  ;;  %560 = vmatprep.subr.mxu1 %v2000_v47 }
 0x14c   :  { %490 = vmatpush1.msra.mxu0 %v1973_v38  ;;  %561 = vmatpush1.msra.mxu1 %v2006_v49 }
 0x14d   :  { %491 = vmatprep.subr.mxu0 %v1979_v40  ;;  %562 = vmatprep.subr.mxu1 %v2012_v51 }
 0x14e   :  { %492 = vmatpush1.msra.mxu0 %v1985_v42  ;;  %563 = vmatpush1.msra.mxu1 %v2776_v9 }
 0x14f   :  { %493 = vmatprep.subr.mxu0 %v2777_v44  ;;  %564 = vmatprep.subr.mxu1 %v2778_v54  ;;  %v290_v54 = vld [vmem:[#allocation4 + $0x30] sm:$0xff] }
 0x150   :  { %494 = vmatpush1.msra.mxu0 %v2779_v55  ;;  %565 = vmatpush1.msra.mxu1 %v2780_v57  ;;  %v291_v57 = vld [vmem:[#allocation4 + $0x38] sm:$0xff] }
 0x151   :  { %495 = vmatprep.subr.mxu0 %v2781_v59  ;;  %566 = vmatprep.subr.mxu1 %v2782_v63 }
 0x152   :  { %496 = vmatpush1.msra.mxu0 %v2783_v0  ;;  %567 = vmatpush1.msra.mxu1 %v2784_v56  ;;  %v2794_v56 = vld [vmem:[#allocation13_spill] sm:$0xff]  ;;  %v289_v0 = vld [vmem:[#allocation4 + $0x28] sm:$0xff] }
 0x153   :  { %497 = vmatprep.subr.mxu0 %v2785_v52  ;;  %568 = vmatprep.subr.mxu1 %v2786_v58  ;;  %v2795_v52 = vld [vmem:[#allocation14_spill] sm:$0xff]  ;;  %v288_v58 = vld [vmem:[#allocation4 + $0x20] sm:$0xff] }
 0x154   :  { %498 = vmatpush1.msra.mxu0 %v2787_v50  ;;  %569 = vmatpush1.msra.mxu1 %v2788_v60 }
 0x155   :  { %499 = vmatprep.subr.mxu0 %v2789_v61  ;;  %570 = vmatprep.subr.mxu1 %v2790_v62 }
 0x156   :  { %500 = vmatpush1.msra.mxu0 %v2791_v46  ;;  %533 = vmatprep.mubr.f32.mxu0 %v2792_v1 }
 0x157   :  { %571 = vmatpush1.msra.mxu1 %v2793_v48  ;;  %604 = vmatprep.mubr.f32.mxu1 %v2792_v1 }
 0x158   :  { %646 = vmatprep.subr.mxu0 %v2794_v56  ;;  %717 = vmatprep.subr.mxu1 %v2795_v52 }
 0x1f7   :  { %v358_v50 = vpop.f32.mrf.mxu0  ;;  %v429_v62 = vpop.f32.mrf.mxu1 }
 0x1f8   :  { %v434_v60 = vadd.f32 %v358_v50, %v288_v58  ;;  %v436_v56 = vadd.f32 %v429_v62, %v290_v54  ;;  %v2801_v62 = vld [vmem:[#allocation25_spill] sm:$0xff] }
 0x1f9   :  { %v360_v63 = vpop.f32.mrf.mxu0  ;;  %v431_v55 = vpop.f32.mrf.mxu1 }
 0x1fa   :  { %v1549_v61 = vmul.f32 -1.442695, %v434_v60  ;;  %v435_v59 = vadd.f32 %v360_v63, %v289_v0  ;;  %v437_v48 = vadd.f32 %v431_v55, %v291_v57 }
 0x1fc   :  { %1594 = vpow2.f32 %v1549_v61  ;;  %v1550_v46 = vmul.f32 -1.442695, %v435_v59  ;;  %v1551_v1 = vmul.f32 -1.442695, %v437_v48  ;;  %v2804_v48 = vld [vmem:[#allocation19_spill] sm:$0xff] }
 0x1fe   :  { %1596 = vpow2.f32 %v1550_v46  ;;  %v2802_v46 = vld [vmem:[#allocation18_spill] sm:$0xff] }
 0x1ff   :  { %1598 = vpow2.f32 %v1551_v1  ;;  %v2803_v1 = vld [vmem:[#allocation27_spill] sm:$0xff] }
 0x209   :  { %v1595_v44 = vpop.eup %1594 }
 0x20a   :  { %v441_v9 = vadd.f32 1.0, %v1595_v44 }
 0x20b   :  { %v1597_v52 = vpop.eup %1596 }
 0x20c   :  { %1600 = vrcp.f32 %v441_v9  ;;  %v447_v42 = vadd.f32 1.0, %v1597_v52  ;;  %v1599_v58 = vpop.eup %1598  ;;  %v2798_v9 = vld [vmem:[#allocation16_spill] sm:$0xff]  ;;  %v2800_v52 = vld [vmem:[#allocation17_spill] sm:$0xff] }
 0x20d   :  { %1602 = vtanh.f32 %v436_v56  ;;  %v454_v59 = vadd.f32 1.0, %v1599_v58  ;;  %v2799_v56 = vld [vmem:[#allocation23_spill] sm:$0xff]  ;;  %v2805_v58 = vld [vmem:[#allocation28_spill] sm:$0xff] }
 0x20e   :  { %1604 = vrcp.f32 %v447_v42  ;;  %v2796_v42 = vld [vmem:[#allocation15_spill] sm:$0xff] }
 0x20f   :  { %1606 = vrcp.f32 %v454_v59  ;;  %v2809_v59 = vld [vmem:[#allocation30_spill] sm:$0xff] }
 0x219   :  { %v1601_v63 = vpop.eup %1600 }
 0x21a   :  { %v1603_v0 = vpop.eup %1602 }
 0x21b   :  { %v1605_v50 = vpop.eup %1604  ;;  %v458_v60 = vmul.f32 %v1603_v0, %v1601_v63  ;;  %v2806_v63 = vld [vmem:[#allocation20_spill] sm:$0xff]  ;;  %v2807_v0 = vld [vmem:[#allocation29_spill] sm:$0xff] }
 0x21c   :  { %v457_v61 = vmul.f32 %v1605_v50, %v2129_v53  ;;  %v1607_v44 = vpop.eup %1606  ;;  %v2797_v53 = vld [vmem:[#allocation21_spill] sm:$0xff]  ;;  %v2808_v50 = vld [vmem:[#allocation22_spill] sm:$0xff] }
 0x21e   :  { %v2199_v55 = vadd.f32 %v458_v60, %v457_v61  ;;  %v2810_v60 = vld [vmem:[#allocation24_spill] sm:$0xff]  ;;  %v2811_v61 = vld [vmem:[#allocation31_spill] sm:$0xff] }
 0x220   :  { %1608 = vtanh.f32 %v2199_v55 }
 0x22d   :  { %v1609_v54 = vpop.eup %1608 }
 0x22e   :  { %v461_v57 = vmul.f32 %v1609_v54, %v1607_v44  ;;  %v2812_v44 = vld [vmem:[#allocation26_spill] sm:$0xff]  ;;  %v2813_v54 = vmov 0.0  }
 0x230   :  { %463 = vst [vmem:[#allocation9 + $0x8] sm:$0xff] %v461_v57  ;;  %534 = vmatmul.mubr.f32.vlgmr.msra.gmra.mxu0 %v461_v57  ;;  %605 = vmatmul.mubr.f32.vlgmr.msra.gmra.mxu1 %v461_v57  ;;  %v2814_v57 = vld [vmem:[#allocation32_spill] sm:$0xff] }
 0x231   :  { %647 = vmatpush1.msra.mxu0 %v1869_v2  ;;  %718 = vmatpush1.msra.mxu1 %v1894_v11 }
 0x232   :  { %648 = vmatprep.subr.mxu0 %v1871_v3  ;;  %719 = vmatprep.subr.mxu1 %v1900_v13 }
 0x233   :  { %649 = vmatpush1.msra.mxu0 %v1874_v4  ;;  %720 = vmatpush1.msra.mxu1 %v1902_v14 }
 0x234   :  { %650 = vmatprep.subr.mxu0 %v1877_v5  ;;  %721 = vmatprep.subr.mxu1 %v1908_v16 }
 0x235   :  { %651 = vmatpush1.msra.mxu0 %v1880_v6  ;;  %722 = vmatpush1.msra.mxu1 %v1914_v18 }
 0x236   :  { %652 = vmatprep.subr.mxu0 %v1883_v7  ;;  %723 = vmatprep.subr.mxu1 %v1916_v19 }
 0x237   :  { %653 = vmatpush1.msra.mxu0 %v1886_v8  ;;  %724 = vmatpush1.msra.mxu1 %v1922_v21 }
 0x238   :  { %654 = vmatprep.subr.mxu0 %v1891_v10  ;;  %725 = vmatprep.subr.mxu1 %v1928_v23 }
 0x239   :  { %655 = vmatpush1.msra.mxu0 %v1897_v12  ;;  %726 = vmatpush1.msra.mxu1 %v1934_v25 }
 0x23a   :  { %656 = vmatprep.subr.mxu0 %v1905_v15  ;;  %727 = vmatprep.subr.mxu1 %v1940_v27 }
 0x23b   :  { %657 = vmatpush1.msra.mxu0 %v1911_v17  ;;  %728 = vmatpush1.msra.mxu1 %v1946_v29 }
 0x23c   :  { %658 = vmatprep.subr.mxu0 %v1919_v20  ;;  %729 = vmatprep.subr.mxu1 %v1952_v31 }
 0x23d   :  { %659 = vmatpush1.msra.mxu0 %v1925_v22  ;;  %730 = vmatpush1.msra.mxu1 %v1958_v33 }
 0x23e   :  { %660 = vmatprep.subr.mxu0 %v1931_v24  ;;  %731 = vmatprep.subr.mxu1 %v1964_v35 }
 0x23f   :  { %661 = vmatpush1.msra.mxu0 %v1937_v26  ;;  %732 = vmatpush1.msra.mxu1 %v1970_v37 }
 0x240   :  { %662 = vmatprep.subr.mxu0 %v1943_v28  ;;  %733 = vmatprep.subr.mxu1 %v1976_v39 }
 0x241   :  { %663 = vmatpush1.msra.mxu0 %v1949_v30  ;;  %734 = vmatpush1.msra.mxu1 %v1982_v41 }
 0x242   :  { %664 = vmatprep.subr.mxu0 %v1955_v32  ;;  %735 = vmatprep.subr.mxu1 %v1988_v43 }
 0x243   :  { %665 = vmatpush1.msra.mxu0 %v1961_v34  ;;  %736 = vmatpush1.msra.mxu1 %v1994_v45 }
 0x244   :  { %666 = vmatprep.subr.mxu0 %v1967_v36  ;;  %737 = vmatprep.subr.mxu1 %v2000_v47 }
 0x245   :  { %667 = vmatpush1.msra.mxu0 %v1973_v38  ;;  %738 = vmatpush1.msra.mxu1 %v2006_v49 }
 0x246   :  { %668 = vmatprep.subr.mxu0 %v1979_v40  ;;  %739 = vmatprep.subr.mxu1 %v2012_v51 }
 0x247   :  { %669 = vmatpush1.msra.mxu0 %v2796_v42  ;;  %740 = vmatpush1.msra.mxu1 %v2797_v53 }
 0x248   :  { %670 = vmatprep.subr.mxu0 %v2798_v9  ;;  %741 = vmatprep.subr.mxu1 %v2799_v56  ;;  %v467_v56 = vld [vmem:[#allocation4 + $0x50] sm:$0xff] }
 0x249   :  { %671 = vmatpush1.msra.mxu0 %v2800_v52  ;;  %742 = vmatpush1.msra.mxu1 %v2801_v62  ;;  %v468_v62 = vld [vmem:[#allocation4 + $0x58] sm:$0xff] }
 0x24a   :  { %672 = vmatprep.subr.mxu0 %v2802_v46  ;;  %743 = vmatprep.subr.mxu1 %v2803_v1 }
 0x24b   :  { %673 = vmatpush1.msra.mxu0 %v2804_v48  ;;  %744 = vmatpush1.msra.mxu1 %v2805_v58  ;;  %v2815_v58 = vld [vmem:[#allocation13_spill] sm:$0xff]  ;;  %v466_v48 = vld [vmem:[#allocation4 + $0x48] sm:$0xff] }
 0x24c   :  { %674 = vmatprep.subr.mxu0 %v2806_v63  ;;  %745 = vmatprep.subr.mxu1 %v2807_v0  ;;  %v2816_v63 = vld [vmem:[#allocation14_spill] sm:$0xff]  ;;  %v465_v0 = vld [vmem:[#allocation4 + $0x40] sm:$0xff] }
 0x24d   :  { %675 = vmatpush1.msra.mxu0 %v2808_v50  ;;  %746 = vmatpush1.msra.mxu1 %v2809_v59 }
 0x24e   :  { %676 = vmatprep.subr.mxu0 %v2810_v60  ;;  %747 = vmatprep.subr.mxu1 %v2811_v61 }
 0x24f   :  { %677 = vmatpush1.msra.mxu0 %v2812_v44  ;;  %710 = vmatprep.mubr.f32.mxu0 %v2813_v54 }
 0x250   :  { %748 = vmatpush1.msra.mxu1 %v2814_v57  ;;  %781 = vmatprep.mubr.f32.mxu1 %v2813_v54 }
 0x251   :  { %823 = vmatprep.subr.mxu0 %v2815_v58  ;;  %894 = vmatprep.subr.mxu1 %v2816_v63 }
 0x2f0   :  { %v535_v50 = vpop.f32.mrf.mxu0  ;;  %v606_v61 = vpop.f32.mrf.mxu1 }
 0x2f1   :  { %v611_v59 = vadd.f32 %v535_v50, %v465_v0  ;;  %v613_v58 = vadd.f32 %v606_v61, %v467_v56 }
 0x2f2   :  { %v537_v1 = vpop.f32.mrf.mxu0  ;;  %v608_v52 = vpop.f32.mrf.mxu1 }
 0x2f3   :  { %v1552_v60 = vmul.f32 -1.442695, %v611_v59  ;;  %v612_v46 = vadd.f32 %v537_v1, %v466_v48  ;;  %v614_v57 = vadd.f32 %v608_v52, %v468_v62 }
 0x2f5   :  { %1610 = vpow2.f32 %v1552_v60  ;;  %v1553_v44 = vmul.f32 -1.442695, %v612_v46  ;;  %v1554_v54 = vmul.f32 -1.442695, %v614_v57 }
 0x2f7   :  { %1612 = vpow2.f32 %v1553_v44 }
 0x2f8   :  { %1614 = vpow2.f32 %v1554_v54 }
 0x302   :  { %v1611_v9 = vpop.eup %1610 }
 0x303   :  { %v618_v53 = vadd.f32 1.0, %v1611_v9 }
 0x304   :  { %v1613_v63 = vpop.eup %1612 }
 0x305   :  { %1616 = vrcp.f32 %v618_v53  ;;  %v624_v42 = vadd.f32 1.0, %v1613_v63  ;;  %v1615_v0 = vpop.eup %1614 }
 0x306   :  { %1618 = vtanh.f32 %v613_v58  ;;  %v631_v46 = vadd.f32 1.0, %v1615_v0  ;;  %v2344_v0 = vld [vmem:[#allocation7 + $0x1e0] sm:$0xff] }
 0x307   :  { %1620 = vrcp.f32 %v624_v42 }
 0x308   :  { %1622 = vrcp.f32 %v631_v46  ;;  %v2356_v46 = vld [vmem:[#allocation7 + $0x1c0] sm:$0xff] }
 0x312   :  { %v1617_v1 = vpop.eup %1616 }
 0x313   :  { %v1619_v48 = vpop.eup %1618 }
 0x314   :  { %v1621_v50 = vpop.eup %1620  ;;  %v635_v59 = vmul.f32 %v1619_v48, %v1617_v1  ;;  %v2347_v1 = vld [vmem:[#allocation7 + $0x1f0] sm:$0xff]  ;;  %v2350_v48 = vld [vmem:[#allocation7 + $0x1c8] sm:$0xff] }
 0x315   :  { %v634_v60 = vmul.f32 %v1621_v50, %v2199_v55  ;;  %v1623_v9 = vpop.eup %1622  ;;  %v2353_v50 = vld [vmem:[#allocation7 + $0x1d8] sm:$0xff] }
 0x317   :  { %v2269_v52 = vadd.f32 %v635_v59, %v634_v60  ;;  %v2359_v59 = vld [vmem:[#allocation7 + $0x1d0] sm:$0xff]  ;;  %v2362_v60 = vld [vmem:[#allocation7 + $0x1a8] sm:$0xff] }
 0x319   :  { %1624 = vtanh.f32 %v2269_v52 }
 0x326   :  { %v1625_v56 = vpop.eup %1624 }
 0x327   :  { %v638_v62 = vmul.f32 %v1625_v56, %v1623_v9  ;;  %v2368_v9 = vld [vmem:[#allocation7 + $0x1a0] sm:$0xff]  ;;  %v2371_v56 = vld [vmem:[#allocation7 + $0x1b0] sm:$0xff] }
 0x329   :  { %640 = vst [vmem:[#allocation9 + $0x10] sm:$0xff] %v638_v62  ;;  %711 = vmatmul.mubr.f32.vlgmr.msra.gmra.mxu0 %v638_v62  ;;  %782 = vmatmul.mubr.f32.vlgmr.msra.gmra.mxu1 %v638_v62  ;;  %v2374_v62 = vld [vmem:[#allocation7 + $0x188] sm:$0xff] }
 0x32a   :  { %824 = vmatpush1.msra.mxu0 %v1869_v2  ;;  %895 = vmatpush1.msra.mxu1 %v1894_v11  ;;  %v2817_v2 = vld [vmem:[#allocation15_spill] sm:$0xff] }
 0x32b   :  { %825 = vmatprep.subr.mxu0 %v1871_v3  ;;  %896 = vmatprep.subr.mxu1 %v1900_v13  ;;  %v2818_v3 = vld [vmem:[#allocation21_spill] sm:$0xff]  ;;  %v2825_v11 = vld [vmem:[#allocation19_spill] sm:$0xff]  ;;  %v2827_v13 = vld [vmem:[#allocation20_spill] sm:$0xff] }
 0x32c   :  { %826 = vmatpush1.msra.mxu0 %v1874_v4  ;;  %897 = vmatpush1.msra.mxu1 %v1902_v14  ;;  %v2819_v4 = vld [vmem:[#allocation16_spill] sm:$0xff]  ;;  %v2828_v14 = vld [vmem:[#allocation29_spill] sm:$0xff] }
 0x32d   :  { %827 = vmatprep.subr.mxu0 %v1877_v5  ;;  %898 = vmatprep.subr.mxu1 %v1908_v16  ;;  %v2820_v5 = vld [vmem:[#allocation23_spill] sm:$0xff]  ;;  %v2830_v16 = vld [vmem:[#allocation30_spill] sm:$0xff] }
 0x32e   :  { %828 = vmatpush1.msra.mxu0 %v1880_v6  ;;  %899 = vmatpush1.msra.mxu1 %v1914_v18  ;;  %v2821_v6 = vld [vmem:[#allocation17_spill] sm:$0xff]  ;;  %v2832_v18 = vld [vmem:[#allocation31_spill] sm:$0xff] }
 0x32f   :  { %829 = vmatprep.subr.mxu0 %v1883_v7  ;;  %900 = vmatprep.subr.mxu1 %v1916_v19  ;;  %v2822_v7 = vld [vmem:[#allocation25_spill] sm:$0xff]  ;;  %v2833_v19 = vld [vmem:[#allocation26_spill] sm:$0xff] }
 0x330   :  { %830 = vmatpush1.msra.mxu0 %v1886_v8  ;;  %901 = vmatpush1.msra.mxu1 %v1922_v21  ;;  %v2823_v8 = vld [vmem:[#allocation18_spill] sm:$0xff]  ;;  %v2835_v21 = vld [vmem:[#allocation32_spill] sm:$0xff] }
 0x331   :  { %831 = vmatprep.subr.mxu0 %v1891_v10  ;;  %902 = vmatprep.subr.mxu1 %v1928_v23  ;;  %v2824_v10 = vld [vmem:[#allocation27_spill] sm:$0xff]  ;;  %v2837_v23 = vld [vmem:[#allocation14_spill] sm:$0xff] }
 0x332   :  { %832 = vmatpush1.msra.mxu0 %v1897_v12  ;;  %903 = vmatpush1.msra.mxu1 %v1934_v25  ;;  %v2826_v12 = vld [vmem:[#allocation28_spill] sm:$0xff] }
 0x333   :  { %833 = vmatprep.subr.mxu0 %v1905_v15  ;;  %904 = vmatprep.subr.mxu1 %v1940_v27  ;;  %v2829_v15 = vld [vmem:[#allocation22_spill] sm:$0xff] }
 0x334   :  { %834 = vmatpush1.msra.mxu0 %v1911_v17  ;;  %905 = vmatpush1.msra.mxu1 %v1946_v29  ;;  %v2831_v17 = vld [vmem:[#allocation24_spill] sm:$0xff] }
 0x335   :  { %835 = vmatprep.subr.mxu0 %v1919_v20  ;;  %906 = vmatprep.subr.mxu1 %v1952_v31  ;;  %v2834_v20 = vmov 0.0  }
 0x336   :  { %836 = vmatpush1.msra.mxu0 %v1925_v22  ;;  %907 = vmatpush1.msra.mxu1 %v1958_v33  ;;  %v2336_v22 = vld [vmem:[#allocation7 + $0x1e8] sm:$0xff]  ;;  %v645_v33 = vld [vmem:[#allocation4 + $0x78] sm:$0xff] }
 0x337   :  { %837 = vmatprep.subr.mxu0 %v1931_v24  ;;  %908 = vmatprep.subr.mxu1 %v1964_v35  ;;  %2836 = vst [vmem:[#allocation13_spill] sm:$0xff] %v2336_v22  ;;  %v642_v24 = vld [vmem:[#allocation4 + $0x60] sm:$0xff] }
 0x338   :  { %838 = vmatpush1.msra.mxu0 %v1937_v26  ;;  %909 = vmatpush1.msra.mxu1 %v1970_v37  ;;  %v643_v26 = vld [vmem:[#allocation4 + $0x68] sm:$0xff] }
 0x339   :  { %839 = vmatprep.subr.mxu0 %v1943_v28  ;;  %910 = vmatprep.subr.mxu1 %v1976_v39 }
 0x33a   :  { %840 = vmatpush1.msra.mxu0 %v1949_v30  ;;  %911 = vmatpush1.msra.mxu1 %v1982_v41 }
 0x33b   :  { %841 = vmatprep.subr.mxu0 %v1955_v32  ;;  %912 = vmatprep.subr.mxu1 %v1988_v43 }
 0x33c   :  { %842 = vmatpush1.msra.mxu0 %v1961_v34  ;;  %913 = vmatpush1.msra.mxu1 %v1994_v45 }
 0x33d   :  { %843 = vmatprep.subr.mxu0 %v1967_v36  ;;  %914 = vmatprep.subr.mxu1 %v2000_v47  ;;  %v644_v36 = vld [vmem:[#allocation4 + $0x70] sm:$0xff] }
 0x33e   :  { %844 = vmatpush1.msra.mxu0 %v1973_v38  ;;  %915 = vmatpush1.msra.mxu1 %v2006_v49 }
 0x33f   :  { %845 = vmatprep.subr.mxu0 %v1979_v40  ;;  %916 = vmatprep.subr.mxu1 %v2012_v51 }
 0x340   :  { %846 = vmatpush1.msra.mxu0 %v2817_v2  ;;  %917 = vmatpush1.msra.mxu1 %v2818_v3  ;;  %v2377_v2 = vld [vmem:[#allocation7 + $0x198] sm:$0xff] }
 0x341   :  { %847 = vmatprep.subr.mxu0 %v2819_v4  ;;  %918 = vmatprep.subr.mxu1 %v2820_v5  ;;  %v2380_v4 = vld [vmem:[#allocation7 + $0x180] sm:$0xff] }
 0x342   :  { %848 = vmatpush1.msra.mxu0 %v2821_v6  ;;  %919 = vmatpush1.msra.mxu1 %v2822_v7  ;;  %v2383_v6 = vld [vmem:[#allocation7 + $0x190] sm:$0xff] }
 0x343   :  { %849 = vmatprep.subr.mxu0 %v2823_v8  ;;  %920 = vmatprep.subr.mxu1 %v2824_v10  ;;  %v2386_v8 = vld [vmem:[#allocation7 + $0x168] sm:$0xff] }
 0x344   :  { %850 = vmatpush1.msra.mxu0 %v2825_v11  ;;  %921 = vmatpush1.msra.mxu1 %v2826_v12  ;;  %v2389_v11 = vld [vmem:[#allocation7 + $0x178] sm:$0xff] }
 0x345   :  { %851 = vmatprep.subr.mxu0 %v2827_v13  ;;  %922 = vmatprep.subr.mxu1 %v2828_v14  ;;  %v2392_v13 = vld [vmem:[#allocation7 + $0x160] sm:$0xff] }
 0x346   :  { %852 = vmatpush1.msra.mxu0 %v2829_v15  ;;  %923 = vmatpush1.msra.mxu1 %v2830_v16  ;;  %v2395_v15 = vld [vmem:[#allocation7 + $0x170] sm:$0xff] }
 0x347   :  { %853 = vmatprep.subr.mxu0 %v2831_v17  ;;  %924 = vmatprep.subr.mxu1 %v2832_v18  ;;  %v2398_v17 = vld [vmem:[#allocation7 + $0x148] sm:$0xff] }
 0x348   :  { %854 = vmatpush1.msra.mxu0 %v2833_v19  ;;  %887 = vmatprep.mubr.f32.mxu0 %v2834_v20 }
 0x349   :  { %925 = vmatpush1.msra.mxu1 %v2835_v21  ;;  %958 = vmatprep.mubr.f32.mxu1 %v2834_v20 }
 0x34a   :  { %1000 = vmatprep.subr.mxu0 %v2336_v22  ;;  %1071 = vmatprep.subr.mxu1 %v2837_v23  ;;  %v2401_v23 = vld [vmem:[#allocation7 + $0x158] sm:$0xff] }
 0x3e9   :  { %v712_v25 = vpop.f32.mrf.mxu0  ;;  %v783_v31 = vpop.f32.mrf.mxu1 }
 0x3ea   :  { %v788_v27 = vadd.f32 %v712_v25, %v642_v24  ;;  %v790_v39 = vadd.f32 %v783_v31, %v644_v36  ;;  %v2404_v24 = vld [vmem:[#allocation7 + $0x140] sm:$0xff]  ;;  %v2407_v25 = vld [vmem:[#allocation7 + $0x150] sm:$0xff]  ;;  %v2425_v31 = vld [vmem:[#allocation7 + $0x118] sm:$0xff] }
 0x3eb   :  { %v714_v28 = vpop.f32.mrf.mxu0  ;;  %v785_v34 = vpop.f32.mrf.mxu1  ;;  %v2440_v36 = vld [vmem:[#allocation7 + $0xe0] sm:$0xff] }
 0x3ec   :  { %v1555_v29 = vmul.f32 -1.442695, %v788_v27  ;;  %v789_v30 = vadd.f32 %v714_v28, %v643_v26  ;;  %v791_v35 = vadd.f32 %v785_v34, %v645_v33  ;;  %v2410_v26 = vld [vmem:[#allocation7 + $0x128] sm:$0xff]  ;;  %v2413_v27 = vld [vmem:[#allocation7 + $0x138] sm:$0xff]  ;;  %v2416_v28 = vld [vmem:[#allocation7 + $0x120] sm:$0xff] }
 0x3ed   :  { %v2431_v33 = vld [vmem:[#allocation7 + $0x110] sm:$0xff]  ;;  %v2434_v34 = vld [vmem:[#allocation7 + $0xe8] sm:$0xff] }
 0x3ee   :  { %1626 = vpow2.f32 %v1555_v29  ;;  %v1556_v32 = vmul.f32 -1.442695, %v789_v30  ;;  %v1557_v37 = vmul.f32 -1.442695, %v791_v35  ;;  %v2419_v29 = vld [vmem:[#allocation7 + $0x130] sm:$0xff]  ;;  %v2422_v30 = vld [vmem:[#allocation7 + $0x108] sm:$0xff] }
 0x3ef   :  { %v2437_v35 = vld [vmem:[#allocation7 + $0xf8] sm:$0xff] }
 0x3f0   :  { %1628 = vpow2.f32 %v1556_v32  ;;  %v2428_v32 = vld [vmem:[#allocation7 + $0x100] sm:$0xff] }
 0x3f1   :  { %1630 = vpow2.f32 %v1557_v37  ;;  %v2443_v37 = vld [vmem:[#allocation7 + $0xf0] sm:$0xff] }
 0x3fb   :  { %v1627_v38 = vpop.eup %1626 }
 0x3fc   :  { %v795_v40 = vadd.f32 1.0, %v1627_v38  ;;  %v2446_v38 = vld [vmem:[#allocation7 + $0xc8] sm:$0xff] }
 0x3fd   :  { %v1629_v41 = vpop.eup %1628 }
 0x3fe   :  { %1632 = vrcp.f32 %v795_v40  ;;  %v801_v43 = vadd.f32 1.0, %v1629_v41  ;;  %v1631_v45 = vpop.eup %1630  ;;  %v2452_v40 = vld [vmem:[#allocation7 + $0xc0] sm:$0xff]  ;;  %v2455_v41 = vld [vmem:[#allocation7 + $0xd0] sm:$0xff] }
 0x3ff   :  { %1634 = vtanh.f32 %v790_v39  ;;  %v808_v53 = vadd.f32 1.0, %v1631_v45  ;;  %v2449_v39 = vld [vmem:[#allocation7 + $0xd8] sm:$0xff] }
 0x400   :  { %1636 = vrcp.f32 %v801_v43  ;;  %v2458_v43 = vld [vmem:[#allocation7 + $0xa8] sm:$0xff]  ;;  %v2461_v45 = vld [vmem:[#allocation7 + $0xb8] sm:$0xff] }
 0x401   :  { %1638 = vrcp.f32 %v808_v53  ;;  %v2476_v53 = vld [vmem:[#allocation7 + $0x68] sm:$0xff] }
 0x402   :  { %2839 = vst [vmem:[#allocation21_spill] sm:$0xff] %v2476_v53 }
 0x40b   :  { %v1633_v47 = vpop.eup %1632 }
 0x40c   :  { %v1635_v55 = vpop.eup %1634 }
 0x40d   :  { %v1637_v42 = vpop.eup %1636  ;;  %v812_v63 = vmul.f32 %v1635_v55, %v1633_v47  ;;  %v2464_v47 = vld [vmem:[#allocation7 + $0xa0] sm:$0xff]  ;;  %v2468_v55 = vld [vmem:[#allocation7 + $0x88] sm:$0xff] }
 0x40e   :  { %v811_v61 = vmul.f32 %v1637_v42, %v2269_v52  ;;  %v1639_v54 = vpop.eup %1638  ;;  %v2365_v52 = vld [vmem:[#allocation7 + $0x1b8] sm:$0xff]  ;;  %v2472_v42 = vld [vmem:[#allocation7 + $0x80] sm:$0xff] }
 0x40f   :  { %2838 = vst [vmem:[#allocation15_spill] sm:$0xff] %v2472_v42 }
 0x410   :  { %v2341_v44 = vadd.f32 %v812_v63, %v811_v61  ;;  %v2480_v63 = vld [vmem:[#allocation7 + $0x60] sm:$0xff] }
 0x411   :  { %2840 = vst [vmem:[#allocation16_spill] sm:$0xff] %v2480_v63 }
 0x412   :  { %1640 = vtanh.f32 %v2341_v44 }
 0x41f   :  { %v1641_v57 = vpop.eup %1640 }
 0x420   :  { %v815_v58 = vmul.f32 %v1641_v57, %v1639_v54 }
 0x422   :  { %817 = vst [vmem:[#allocation9 + $0x18] sm:$0xff] %v815_v58  ;;  %888 = vmatmul.mubr.f32.vlgmr.msra.gmra.mxu0 %v815_v58  ;;  %959 = vmatmul.mubr.f32.vlgmr.msra.gmra.mxu1 %v815_v58 }
 0x423   :  { %1001 = vmatpush1.msra.mxu0 %v2344_v0  ;;  %1072 = vmatpush1.msra.mxu1 %v2347_v1 }
 0x424   :  { %1002 = vmatprep.subr.mxu0 %v2350_v48  ;;  %1073 = vmatprep.subr.mxu1 %v2353_v50 }
 0x425   :  { %1003 = vmatpush1.msra.mxu0 %v2356_v46  ;;  %1074 = vmatpush1.msra.mxu1 %v2359_v59 }
 0x426   :  { %1004 = vmatprep.subr.mxu0 %v2362_v60  ;;  %1075 = vmatprep.subr.mxu1 %v2365_v52 }
 0x427   :  { %1005 = vmatpush1.msra.mxu0 %v2368_v9  ;;  %1076 = vmatpush1.msra.mxu1 %v2371_v56 }
 0x428   :  { %1006 = vmatprep.subr.mxu0 %v2374_v62  ;;  %1077 = vmatprep.subr.mxu1 %v2377_v2 }
 0x429   :  { %1007 = vmatpush1.msra.mxu0 %v2380_v4  ;;  %1078 = vmatpush1.msra.mxu1 %v2383_v6 }
 0x42a   :  { %1008 = vmatprep.subr.mxu0 %v2386_v8  ;;  %1079 = vmatprep.subr.mxu1 %v2389_v11 }
 0x42b   :  { %1009 = vmatpush1.msra.mxu0 %v2392_v13  ;;  %1080 = vmatpush1.msra.mxu1 %v2395_v15 }
 0x42c   :  { %1010 = vmatprep.subr.mxu0 %v2398_v17  ;;  %1081 = vmatprep.subr.mxu1 %v2401_v23 }
 0x42d   :  { %1011 = vmatpush1.msra.mxu0 %v2404_v24  ;;  %1082 = vmatpush1.msra.mxu1 %v2407_v25 }
 0x42e   :  { %1012 = vmatprep.subr.mxu0 %v2410_v26  ;;  %1083 = vmatprep.subr.mxu1 %v2413_v27 }
 0x42f   :  { %1013 = vmatpush1.msra.mxu0 %v2416_v28  ;;  %1084 = vmatpush1.msra.mxu1 %v2419_v29 }
 0x430   :  { %1014 = vmatprep.subr.mxu0 %v2422_v30  ;;  %1085 = vmatprep.subr.mxu1 %v2425_v31 }
 0x431   :  { %1015 = vmatpush1.msra.mxu0 %v2428_v32  ;;  %1086 = vmatpush1.msra.mxu1 %v2431_v33 }
 0x432   :  { %1016 = vmatprep.subr.mxu0 %v2434_v34  ;;  %1087 = vmatprep.subr.mxu1 %v2437_v35 }
 0x433   :  { %1017 = vmatpush1.msra.mxu0 %v2440_v36  ;;  %1088 = vmatpush1.msra.mxu1 %v2443_v37 }
 0x434   :  { %1018 = vmatprep.subr.mxu0 %v2446_v38  ;;  %1089 = vmatprep.subr.mxu1 %v2449_v39 }
 0x435   :  { %1019 = vmatpush1.msra.mxu0 %v2452_v40  ;;  %1090 = vmatpush1.msra.mxu1 %v2455_v41 }
 0x436   :  { %1020 = vmatprep.subr.mxu0 %v2458_v43  ;;  %1091 = vmatprep.subr.mxu1 %v2461_v45 }
 0x437   :  { %1021 = vmatpush1.msra.mxu0 %v2464_v47  ;;  %1092 = vmatpush1.msra.mxu1 %v2006_v49  ;;  %v2484_v49 = vld [vmem:[#allocation7 + $0x48] sm:$0xff] }
 0x438   :  { %1022 = vmatprep.subr.mxu0 %v2468_v55  ;;  %1093 = vmatprep.subr.mxu1 %v2012_v51  ;;  %2841 = vst [vmem:[#allocation23_spill] sm:$0xff] %v2484_v49  ;;  %v2488_v51 = vld [vmem:[#allocation7 + $0x40] sm:$0xff] }
 0x439   :  { %1023 = vmatpush1.msra.mxu0 %v2472_v42  ;;  %1094 = vmatpush1.msra.mxu1 %v2818_v3  ;;  %2842 = vst [vmem:[#allocation17_spill] sm:$0xff] %v2488_v51  ;;  %v2492_v3 = vld [vmem:[#allocation7 + $0x28] sm:$0xff] }
 0x43a   :  { %1024 = vmatprep.subr.mxu0 %v2476_v53  ;;  %1095 = vmatprep.subr.mxu1 %v2820_v5  ;;  %2843 = vst [vmem:[#allocation25_spill] sm:$0xff] %v2492_v3  ;;  %v2496_v5 = vld [vmem:[#allocation7 + $0x20] sm:$0xff] }
 0x43b   :  { %1025 = vmatpush1.msra.mxu0 %v2480_v63  ;;  %1096 = vmatpush1.msra.mxu1 %v2822_v7  ;;  %2844 = vst [vmem:[#allocation18_spill] sm:$0xff] %v2496_v5  ;;  %v2500_v7 = vld [vmem:[#allocation7 + $0x8] sm:$0xff] }
 0x43c   :  { %1026 = vmatprep.subr.mxu0 %v2484_v49  ;;  %1097 = vmatprep.subr.mxu1 %v2824_v10  ;;  %2845 = vst [vmem:[#allocation27_spill] sm:$0xff] %v2500_v7  ;;  %v2509_v10 = vld [vmem:[#allocation7 + $0x1f8] sm:$0xff] }
 0x43d   :  { %1027 = vmatpush1.msra.mxu0 %v2488_v51  ;;  %1098 = vmatpush1.msra.mxu1 %v2826_v12  ;;  %2846 = vst [vmem:[#allocation19_spill] sm:$0xff] %v2509_v10  ;;  %v819_v12 = vld [vmem:[#allocation4 + $0x80] sm:$0xff] }
 0x43e   :  { %1028 = vmatprep.subr.mxu0 %v2492_v3  ;;  %1099 = vmatprep.subr.mxu1 %v2828_v14 }
 0x43f   :  { %1029 = vmatpush1.msra.mxu0 %v2496_v5  ;;  %1100 = vmatpush1.msra.mxu1 %v2830_v16  ;;  %v820_v16 = vld [vmem:[#allocation4 + $0x88] sm:$0xff]  ;;  %v821_v5 = vld [vmem:[#allocation4 + $0x90] sm:$0xff] }
 0x440   :  { %1030 = vmatprep.subr.mxu0 %v2500_v7  ;;  %1101 = vmatprep.subr.mxu1 %v2832_v18 }
 0x441   :  { %1031 = vmatpush1.msra.mxu0 %v2833_v19  ;;  %1064 = vmatprep.mubr.f32.mxu0 %v2834_v20 }
 0x442   :  { %1102 = vmatpush1.msra.mxu1 %v2835_v21  ;;  %1135 = vmatprep.mubr.f32.mxu1 %v2834_v20  ;;  %v822_v21 = vld [vmem:[#allocation4 + $0x98] sm:$0xff] }
 0x443   :  { %1177 = vmatprep.subr.mxu0 %v2336_v22  ;;  %1248 = vmatprep.subr.mxu1 %v2509_v10 }
 0x4e2   :  { %v889_v14 = vpop.f32.mrf.mxu0  ;;  %v960_v19 = vpop.f32.mrf.mxu1 }
 0x4e3   :  { %v965_v61 = vadd.f32 %v889_v14, %v819_v12  ;;  %v967_v51 = vadd.f32 %v960_v19, %v821_v5  ;;  %v2849_v5 = vld [vmem:[#allocation16_spill] sm:$0xff]  ;;  %v2851_v19 = vld [vmem:[#allocation23_spill] sm:$0xff] }
 0x4e4   :  { %v891_v54 = vpop.f32.mrf.mxu0  ;;  %v962_v7 = vpop.f32.mrf.mxu1 }
 0x4e5   :  { %v1558_v18 = vmul.f32 -1.442695, %v965_v61  ;;  %v966_v57 = vadd.f32 %v891_v54, %v820_v16  ;;  %v968_v20 = vadd.f32 %v962_v7, %v822_v21  ;;  %v2853_v21 = vld [vmem:[#allocation17_spill] sm:$0xff] }
 0x4e7   :  { %1642 = vpow2.f32 %v1558_v18  ;;  %v1559_v58 = vmul.f32 -1.442695, %v966_v57  ;;  %v1560_v22 = vmul.f32 -1.442695, %v968_v20 }
 0x4e9   :  { %1644 = vpow2.f32 %v1559_v58  ;;  %v2577_v58 = vld [vmem:[#allocation7 + $0x58] sm:$0xff] }
 0x4ea   :  { %1646 = vpow2.f32 %v1560_v22  ;;  %2852 = vst [vmem:[#allocation22_spill] sm:$0xff] %v2577_v58 }
 0x4f4   :  { %v1643_v3 = vpop.eup %1642 }
 0x4f5   :  { %v972_v49 = vadd.f32 1.0, %v1643_v3 }
 0x4f6   :  { %v1645_v10 = vpop.eup %1644 }
 0x4f7   :  { %1648 = vrcp.f32 %v972_v49  ;;  %v978_v63 = vadd.f32 1.0, %v1645_v10  ;;  %v1647_v12 = vpop.eup %1646  ;;  %v2565_v49 = vld [vmem:[#allocation7 + $0x90] sm:$0xff] }
 0x4f8   :  { %1650 = vtanh.f32 %v967_v51  ;;  %v985_v54 = vadd.f32 1.0, %v1647_v12  ;;  %2847 = vst [vmem:[#allocation28_spill] sm:$0xff] %v2565_v49  ;;  %v2569_v51 = vld [vmem:[#allocation7 + $0x78] sm:$0xff]  ;;  %v2573_v10 = vld [vmem:[#allocation7 + $0x70] sm:$0xff] }
 0x4f9   :  { %1652 = vrcp.f32 %v978_v63  ;;  %v2561_v63 = vld [vmem:[#allocation7 + $0x98] sm:$0xff]  ;;  %2848 = vst [vmem:[#allocation20_spill] sm:$0xff] %v2569_v51  ;;  %2850 = vst [vmem:[#allocation29_spill] sm:$0xff] %v2573_v10  ;;  %v2581_v12 = vld [vmem:[#allocation7 + $0x50] sm:$0xff] }
 0x4fa   :  { %1654 = vrcp.f32 %v985_v54  ;;  %2854 = vst [vmem:[#allocation30_spill] sm:$0xff] %v2581_v12  ;;  %v2589_v54 = vld [vmem:[#allocation7 + $0x30] sm:$0xff] }
 0x4fb   :  { %2858 = vst [vmem:[#allocation31_spill] sm:$0xff] %v2589_v54 }
 0x504   :  { %v1649_v14 = vpop.eup %1648 }
 0x505   :  { %v1651_v16 = vpop.eup %1650 }
 0x506   :  { %v1653_v61 = vpop.eup %1652  ;;  %v989_v18 = vmul.f32 %v1651_v16, %v1649_v14  ;;  %v2855_v14 = vld [vmem:[#allocation25_spill] sm:$0xff]  ;;  %v2585_v16 = vld [vmem:[#allocation7 + $0x38] sm:$0xff] }
 0x507   :  { %v988_v57 = vmul.f32 %v1653_v61, %v2341_v44  ;;  %v1655_v20 = vpop.eup %1654  ;;  %v2557_v44 = vld [vmem:[#allocation7 + $0xb0] sm:$0xff]  ;;  %2856 = vst [vmem:[#allocation24_spill] sm:$0xff] %v2585_v16  ;;  %v2857_v61 = vld [vmem:[#allocation18_spill] sm:$0xff] }
 0x509   :  { %v2513_v7 = vadd.f32 %v989_v18, %v988_v57  ;;  %v2859_v18 = vld [vmem:[#allocation27_spill] sm:$0xff]  ;;  %v2593_v57 = vld [vmem:[#allocation7 + $0x18] sm:$0xff] }
 0x50a   :  { %2860 = vst [vmem:[#allocation26_spill] sm:$0xff] %v2593_v57 }
 0x50b   :  { %1656 = vtanh.f32 %v2513_v7 }
 0x518   :  { %v1657_v3 = vpop.eup %1656 }
 0x519   :  { %v992_v22 = vmul.f32 %v1657_v3, %v1655_v20  ;;  %v2596_v20 = vld [vmem:[#allocation7] sm:$0xff]  ;;  %v2862_v3 = vmov 0.0  }
 0x51a   :  { %2861 = vst [vmem:[#allocation32_spill] sm:$0xff] %v2596_v20 }
 0x51b   :  { %994 = vst [vmem:[#allocation9 + $0x20] sm:$0xff] %v992_v22  ;;  %1065 = vmatmul.mubr.f32.vlgmr.msra.gmra.mxu0 %v992_v22  ;;  %1136 = vmatmul.mubr.f32.vlgmr.msra.gmra.mxu1 %v992_v22  ;;  %v2600_v22 = vld [vmem:[#allocation7 + $0x10] sm:$0xff] }
 0x51c   :  { %1178 = vmatpush1.msra.mxu0 %v2344_v0  ;;  %1249 = vmatpush1.msra.mxu1 %v2347_v1  ;;  %2863 = vst [vmem:[#allocation14_spill] sm:$0xff] %v2600_v22 }
 0x51d   :  { %1179 = vmatprep.subr.mxu0 %v2350_v48  ;;  %1250 = vmatprep.subr.mxu1 %v2353_v50 }
 0x51e   :  { %1180 = vmatpush1.msra.mxu0 %v2356_v46  ;;  %1251 = vmatpush1.msra.mxu1 %v2359_v59 }
 0x51f   :  { %1181 = vmatprep.subr.mxu0 %v2362_v60  ;;  %1252 = vmatprep.subr.mxu1 %v2365_v52 }
 0x520   :  { %1182 = vmatpush1.msra.mxu0 %v2368_v9  ;;  %1253 = vmatpush1.msra.mxu1 %v2371_v56 }
 0x521   :  { %1183 = vmatprep.subr.mxu0 %v2374_v62  ;;  %1254 = vmatprep.subr.mxu1 %v2377_v2 }
 0x522   :  { %1184 = vmatpush1.msra.mxu0 %v2380_v4  ;;  %1255 = vmatpush1.msra.mxu1 %v2383_v6 }
 0x523   :  { %1185 = vmatprep.subr.mxu0 %v2386_v8  ;;  %1256 = vmatprep.subr.mxu1 %v2389_v11 }
 0x524   :  { %1186 = vmatpush1.msra.mxu0 %v2392_v13  ;;  %1257 = vmatpush1.msra.mxu1 %v2395_v15 }
 0x525   :  { %1187 = vmatprep.subr.mxu0 %v2398_v17  ;;  %1258 = vmatprep.subr.mxu1 %v2401_v23 }
 0x526   :  { %1188 = vmatpush1.msra.mxu0 %v2404_v24  ;;  %1259 = vmatpush1.msra.mxu1 %v2407_v25 }
 0x527   :  { %1189 = vmatprep.subr.mxu0 %v2410_v26  ;;  %1260 = vmatprep.subr.mxu1 %v2413_v27 }
 0x528   :  { %1190 = vmatpush1.msra.mxu0 %v2416_v28  ;;  %1261 = vmatpush1.msra.mxu1 %v2419_v29 }
 0x529   :  { %1191 = vmatprep.subr.mxu0 %v2422_v30  ;;  %1262 = vmatprep.subr.mxu1 %v2425_v31 }
 0x52a   :  { %1192 = vmatpush1.msra.mxu0 %v2428_v32  ;;  %1263 = vmatpush1.msra.mxu1 %v2431_v33 }
 0x52b   :  { %1193 = vmatprep.subr.mxu0 %v2434_v34  ;;  %1264 = vmatprep.subr.mxu1 %v2437_v35 }
 0x52c   :  { %1194 = vmatpush1.msra.mxu0 %v2440_v36  ;;  %1265 = vmatpush1.msra.mxu1 %v2443_v37 }
 0x52d   :  { %1195 = vmatprep.subr.mxu0 %v2446_v38  ;;  %1266 = vmatprep.subr.mxu1 %v2449_v39 }
 0x52e   :  { %1196 = vmatpush1.msra.mxu0 %v2452_v40  ;;  %1267 = vmatpush1.msra.mxu1 %v2455_v41 }
 0x52f   :  { %1197 = vmatprep.subr.mxu0 %v2458_v43  ;;  %1268 = vmatprep.subr.mxu1 %v2461_v45 }
 0x530   :  { %1198 = vmatpush1.msra.mxu0 %v2464_v47  ;;  %1269 = vmatpush1.msra.mxu1 %v2557_v44 }
 0x531   :  { %1199 = vmatprep.subr.mxu0 %v2468_v55  ;;  %1270 = vmatprep.subr.mxu1 %v2561_v63 }
 0x532   :  { %1200 = vmatpush1.msra.mxu0 %v2472_v42  ;;  %1271 = vmatpush1.msra.mxu1 %v2565_v49 }
 0x533   :  { %1201 = vmatprep.subr.mxu0 %v2476_v53  ;;  %1272 = vmatprep.subr.mxu1 %v2569_v51  ;;  %v998_v51 = vld [vmem:[#allocation4 + $0xb0] sm:$0xff] }
 0x534   :  { %1202 = vmatpush1.msra.mxu0 %v2849_v5  ;;  %1273 = vmatpush1.msra.mxu1 %v2573_v10  ;;  %v999_v10 = vld [vmem:[#allocation4 + $0xb8] sm:$0xff] }
 0x535   :  { %1203 = vmatprep.subr.mxu0 %v2851_v19  ;;  %1274 = vmatprep.subr.mxu1 %v2577_v58 }
 0x536   :  { %1204 = vmatpush1.msra.mxu0 %v2853_v21  ;;  %1275 = vmatpush1.msra.mxu1 %v2581_v12 }
 0x537   :  { %1205 = vmatprep.subr.mxu0 %v2855_v14  ;;  %1276 = vmatprep.subr.mxu1 %v2585_v16  ;;  %v997_v14 = vld [vmem:[#allocation4 + $0xa8] sm:$0xff] }
 0x538   :  { %1206 = vmatpush1.msra.mxu0 %v2857_v61  ;;  %1277 = vmatpush1.msra.mxu1 %v2589_v54  ;;  %v2864_v61 = vld [vmem:[#allocation13_spill] sm:$0xff]  ;;  %v2865_v54 = vld [vmem:[#allocation19_spill] sm:$0xff] }
 0x539   :  { %1207 = vmatprep.subr.mxu0 %v2859_v18  ;;  %1278 = vmatprep.subr.mxu1 %v2593_v57  ;;  %v996_v18 = vld [vmem:[#allocation4 + $0xa0] sm:$0xff] }
 0x53a   :  { %1208 = vmatpush1.msra.mxu0 %v2596_v20  ;;  %1241 = vmatprep.mubr.f32.mxu0 %v2862_v3 }
 0x53b   :  { %1279 = vmatpush1.msra.mxu1 %v2600_v22  ;;  %1312 = vmatprep.mubr.f32.mxu1 %v2862_v3 }
 0x53c   :  { %1354 = vmatprep.subr.mxu0 %v2864_v61  ;;  %1425 = vmatprep.subr.mxu1 %v2865_v54 }
 0x5db   :  { %v1066_v16 = vpop.f32.mrf.mxu0  ;;  %v1137_v20 = vpop.f32.mrf.mxu1 }
 0x5dc   :  { %v1142_v57 = vadd.f32 %v1066_v16, %v996_v18  ;;  %v1144_v61 = vadd.f32 %v1137_v20, %v998_v51 }
 0x5dd   :  { %v1068_v12 = vpop.f32.mrf.mxu0  ;;  %v1139_v5 = vpop.f32.mrf.mxu1 }
 0x5de   :  { %v1561_v21 = vmul.f32 -1.442695, %v1142_v57  ;;  %v1143_v58 = vadd.f32 %v1068_v12, %v997_v14  ;;  %v1145_v22 = vadd.f32 %v1139_v5, %v999_v10 }
 0x5e0   :  { %1658 = vpow2.f32 %v1561_v21  ;;  %v1562_v19 = vmul.f32 -1.442695, %v1143_v58  ;;  %v1563_v3 = vmul.f32 -1.442695, %v1145_v22 }
 0x5e2   :  { %1660 = vpow2.f32 %v1562_v19 }
 0x5e3   :  { %1662 = vpow2.f32 %v1563_v3  ;;  %v1350_v3 = vld [vmem:[#allocation4 + $0xe0] sm:$0xff] }
 0x5ed   :  { %v1659_v53 = vpop.eup %1658 }
 0x5ee   :  { %v1149_v49 = vadd.f32 1.0, %v1659_v53 }
 0x5ef   :  { %v1661_v54 = vpop.eup %1660 }
 0x5f0   :  { %1664 = vrcp.f32 %v1149_v49  ;;  %v1155_v42 = vadd.f32 1.0, %v1661_v54  ;;  %v1663_v16 = vpop.eup %1662 }
 0x5f1   :  { %1666 = vtanh.f32 %v1144_v61  ;;  %v1162_v58 = vadd.f32 1.0, %v1663_v16  ;;  %v1351_v61 = vld [vmem:[#allocation4 + $0xe8] sm:$0xff] }
 0x5f2   :  { %1668 = vrcp.f32 %v1155_v42 }
 0x5f3   :  { %1670 = vrcp.f32 %v1162_v58 }
 0x5fd   :  { %v1665_v12 = vpop.eup %1664 }
 0x5fe   :  { %v1667_v21 = vpop.eup %1666 }
 0x5ff   :  { %v1669_v14 = vpop.eup %1668  ;;  %v1166_v19 = vmul.f32 %v1667_v21, %v1665_v12 }
 0x600   :  { %v1165_v18 = vmul.f32 %v1669_v14, %v2513_v7  ;;  %v1671_v53 = vpop.eup %1670 }
 0x602   :  { %v2607_v5 = vadd.f32 %v1166_v19, %v1165_v18  ;;  %v1353_v19 = vld [vmem:[#allocation4 + $0xf8] sm:$0xff] }
 0x604   :  { %1672 = vtanh.f32 %v2607_v5 }
 0x611   :  { %v1673_v51 = vpop.eup %1672 }
 0x612   :  { %v1169_v10 = vmul.f32 %v1673_v51, %v1671_v53  ;;  %v1352_v53 = vld [vmem:[#allocation4 + $0xf0] sm:$0xff] }
 0x614   :  { %1171 = vst [vmem:[#allocation9 + $0x28] sm:$0xff] %v1169_v10  ;;  %1242 = vmatmul.mubr.f32.vlgmr.msra.gmra.mxu0 %v1169_v10  ;;  %1313 = vmatmul.mubr.f32.vlgmr.msra.gmra.mxu1 %v1169_v10 }
 0x615   :  { %1355 = vmatpush1.msra.mxu0 %v2344_v0  ;;  %1426 = vmatpush1.msra.mxu1 %v2347_v1  ;;  %v2866_v0 = vld [vmem:[#allocation15_spill] sm:$0xff]  ;;  %v2867_v1 = vld [vmem:[#allocation28_spill] sm:$0xff] }
 0x616   :  { %1356 = vmatprep.subr.mxu0 %v2350_v48  ;;  %1427 = vmatprep.subr.mxu1 %v2353_v50  ;;  %v2868_v48 = vld [vmem:[#allocation21_spill] sm:$0xff]  ;;  %v2869_v50 = vld [vmem:[#allocation20_spill] sm:$0xff] }
 0x617   :  { %1357 = vmatpush1.msra.mxu0 %v2356_v46  ;;  %1428 = vmatpush1.msra.mxu1 %v2359_v59  ;;  %v2870_v46 = vld [vmem:[#allocation16_spill] sm:$0xff]  ;;  %v2871_v59 = vld [vmem:[#allocation29_spill] sm:$0xff] }
 0x618   :  { %1358 = vmatprep.subr.mxu0 %v2362_v60  ;;  %1429 = vmatprep.subr.mxu1 %v2365_v52  ;;  %v2872_v60 = vld [vmem:[#allocation23_spill] sm:$0xff]  ;;  %v2873_v52 = vld [vmem:[#allocation22_spill] sm:$0xff] }
 0x619   :  { %1359 = vmatpush1.msra.mxu0 %v2368_v9  ;;  %1430 = vmatpush1.msra.mxu1 %v2371_v56  ;;  %v2874_v9 = vld [vmem:[#allocation17_spill] sm:$0xff]  ;;  %v2875_v56 = vld [vmem:[#allocation30_spill] sm:$0xff] }
 0x61a   :  { %1360 = vmatprep.subr.mxu0 %v2374_v62  ;;  %1431 = vmatprep.subr.mxu1 %v2377_v2  ;;  %v2876_v62 = vld [vmem:[#allocation25_spill] sm:$0xff]  ;;  %v2877_v2 = vld [vmem:[#allocation24_spill] sm:$0xff] }
 0x61b   :  { %1361 = vmatpush1.msra.mxu0 %v2380_v4  ;;  %1432 = vmatpush1.msra.mxu1 %v2383_v6  ;;  %v2878_v4 = vld [vmem:[#allocation18_spill] sm:$0xff]  ;;  %v2879_v6 = vld [vmem:[#allocation31_spill] sm:$0xff] }
 0x61c   :  { %1362 = vmatprep.subr.mxu0 %v2386_v8  ;;  %1433 = vmatprep.subr.mxu1 %v2389_v11  ;;  %v2880_v8 = vld [vmem:[#allocation27_spill] sm:$0xff]  ;;  %v2881_v11 = vld [vmem:[#allocation26_spill] sm:$0xff] }
 0x61d   :  { %1363 = vmatpush1.msra.mxu0 %v2392_v13  ;;  %1434 = vmatpush1.msra.mxu1 %v2395_v15  ;;  %v2882_v13 = vld [vmem:[#allocation32_spill] sm:$0xff]  ;;  %v2883_v15 = vmov 0.0  }
 0x61e   :  { %1364 = vmatprep.subr.mxu0 %v2398_v17  ;;  %1435 = vmatprep.subr.mxu1 %v2401_v23  ;;  %v2884_v17 = vld [vmem:[#allocation14_spill] sm:$0xff]  ;;  %v1173_v23 = vld [vmem:[#allocation4 + $0xc0] sm:$0xff] }
 0x61f   :  { %1365 = vmatpush1.msra.mxu0 %v2404_v24  ;;  %1436 = vmatpush1.msra.mxu1 %v2407_v25  ;;  %v1174_v25 = vld [vmem:[#allocation4 + $0xc8] sm:$0xff] }
 0x620   :  { %1366 = vmatprep.subr.mxu0 %v2410_v26  ;;  %1437 = vmatprep.subr.mxu1 %v2413_v27 }
 0x621   :  { %1367 = vmatpush1.msra.mxu0 %v2416_v28  ;;  %1438 = vmatpush1.msra.mxu1 %v2419_v29 }
 0x622   :  { %1368 = vmatprep.subr.mxu0 %v2422_v30  ;;  %1439 = vmatprep.subr.mxu1 %v2425_v31 }
 0x623   :  { %1369 = vmatpush1.msra.mxu0 %v2428_v32  ;;  %1440 = vmatpush1.msra.mxu1 %v2431_v33  ;;  %v1176_v32 = vld [vmem:[#allocation4 + $0xd8] sm:$0xff] }
 0x624   :  { %1370 = vmatprep.subr.mxu0 %v2434_v34  ;;  %1441 = vmatprep.subr.mxu1 %v2437_v35  ;;  %v1175_v35 = vld [vmem:[#allocation4 + $0xd0] sm:$0xff] }
 0x625   :  { %1371 = vmatpush1.msra.mxu0 %v2440_v36  ;;  %1442 = vmatpush1.msra.mxu1 %v2443_v37 }
 0x626   :  { %1372 = vmatprep.subr.mxu0 %v2446_v38  ;;  %1443 = vmatprep.subr.mxu1 %v2449_v39 }
 0x627   :  { %1373 = vmatpush1.msra.mxu0 %v2452_v40  ;;  %1444 = vmatpush1.msra.mxu1 %v2455_v41 }
 0x628   :  { %1374 = vmatprep.subr.mxu0 %v2458_v43  ;;  %1445 = vmatprep.subr.mxu1 %v2461_v45 }
 0x629   :  { %1375 = vmatpush1.msra.mxu0 %v2464_v47  ;;  %1446 = vmatpush1.msra.mxu1 %v2557_v44 }
 0x62a   :  { %1376 = vmatprep.subr.mxu0 %v2468_v55  ;;  %1447 = vmatprep.subr.mxu1 %v2561_v63 }
 0x62b   :  { %1377 = vmatpush1.msra.mxu0 %v2866_v0  ;;  %1448 = vmatpush1.msra.mxu1 %v2867_v1 }
 0x62c   :  { %1378 = vmatprep.subr.mxu0 %v2868_v48  ;;  %1449 = vmatprep.subr.mxu1 %v2869_v50 }
 0x62d   :  { %1379 = vmatpush1.msra.mxu0 %v2870_v46  ;;  %1450 = vmatpush1.msra.mxu1 %v2871_v59 }
 0x62e   :  { %1380 = vmatprep.subr.mxu0 %v2872_v60  ;;  %1451 = vmatprep.subr.mxu1 %v2873_v52 }
 0x62f   :  { %1381 = vmatpush1.msra.mxu0 %v2874_v9  ;;  %1452 = vmatpush1.msra.mxu1 %v2875_v56 }
 0x630   :  { %1382 = vmatprep.subr.mxu0 %v2876_v62  ;;  %1453 = vmatprep.subr.mxu1 %v2877_v2 }
 0x631   :  { %1383 = vmatpush1.msra.mxu0 %v2878_v4  ;;  %1454 = vmatpush1.msra.mxu1 %v2879_v6 }
 0x632   :  { %1384 = vmatprep.subr.mxu0 %v2880_v8  ;;  %1455 = vmatprep.subr.mxu1 %v2881_v11 }
 0x633   :  { %1385 = vmatpush1.msra.mxu0 %v2882_v13  ;;  %1418 = vmatprep.mubr.f32.mxu0 %v2883_v15 }
 0x634   :  { %1456 = vmatpush1.msra.mxu1 %v2884_v17  ;;  %1489 = vmatprep.mubr.f32.mxu1 %v2883_v15 }
 0x6d4   :  { %v1243_v24 = vpop.f32.mrf.mxu0  ;;  %v1314_v30 = vpop.f32.mrf.mxu1 }
 0x6d5   :  { %v1319_v26 = vadd.f32 %v1243_v24, %v1173_v23  ;;  %v1321_v38 = vadd.f32 %v1314_v30, %v1175_v35 }
 0x6d6   :  { %v1245_v27 = vpop.f32.mrf.mxu0  ;;  %v1316_v33 = vpop.f32.mrf.mxu1 }
 0x6d7   :  { %v1564_v28 = vmul.f32 -1.442695, %v1319_v26  ;;  %v1320_v29 = vadd.f32 %v1245_v27, %v1174_v25  ;;  %v1322_v34 = vadd.f32 %v1316_v33, %v1176_v32 }
 0x6d9   :  { %1674 = vpow2.f32 %v1564_v28  ;;  %v1565_v31 = vmul.f32 -1.442695, %v1320_v29  ;;  %v1566_v36 = vmul.f32 -1.442695, %v1322_v34 }
 0x6db   :  { %1676 = vpow2.f32 %v1565_v31 }
 0x6dc   :  { %1678 = vpow2.f32 %v1566_v36 }
 0x6e6   :  { %v1675_v37 = vpop.eup %1674 }
 0x6e7   :  { %v1326_v39 = vadd.f32 1.0, %v1675_v37 }
 0x6e8   :  { %v1677_v40 = vpop.eup %1676 }
 0x6e9   :  { %1680 = vrcp.f32 %v1326_v39  ;;  %v1332_v41 = vadd.f32 1.0, %v1677_v40  ;;  %v1679_v43 = vpop.eup %1678 }
 0x6ea   :  { %1682 = vtanh.f32 %v1321_v38  ;;  %v1339_v42 = vadd.f32 1.0, %v1679_v43 }
 0x6eb   :  { %1684 = vrcp.f32 %v1332_v41 }
 0x6ec   :  { %1686 = vrcp.f32 %v1339_v42 }
 0x6f6   :  { %v1681_v45 = vpop.eup %1680 }
 0x6f7   :  { %v1683_v47 = vpop.eup %1682 }
 0x6f8   :  { %v1685_v55 = vpop.eup %1684  ;;  %v1343_v7 = vmul.f32 %v1683_v47, %v1681_v45 }
 0x6f9   :  { %v1342_v44 = vmul.f32 %v1685_v55, %v2607_v5  ;;  %v1687_v49 = vpop.eup %1686 }
 0x6fb   :  { %v1344_v63 = vadd.f32 %v1343_v7, %v1342_v44 }
 0x6fd   :  { %1688 = vtanh.f32 %v1344_v63 }
 0x70a   :  { %v1689_v57 = vpop.eup %1688 }
 0x70b   :  { %v1346_v20 = vmul.f32 %v1689_v57, %v1687_v49 }
 0x70d   :  { %1348 = vst [vmem:[#allocation9 + $0x30] sm:$0xff] %v1346_v20  ;;  %1419 = vmatmul.mubr.f32.vlgmr.msra.gmra.mxu0 %v1346_v20  ;;  %1490 = vmatmul.mubr.f32.vlgmr.msra.gmra.mxu1 %v1346_v20 }
 0x7cd   :  { %v1420_v22 = vpop.f32.mrf.mxu0  ;;  %v1491_v14 = vpop.f32.mrf.mxu1 }
 0x7ce   :  { %v1496_v54 = vadd.f32 %v1420_v22, %v1350_v3  ;;  %v1498_v0 = vadd.f32 %v1491_v14, %v1352_v53 }
 0x7cf   :  { %v1422_v16 = vpop.f32.mrf.mxu0  ;;  %v1493_v18 = vpop.f32.mrf.mxu1 }
 0x7d0   :  { %v1567_v12 = vmul.f32 -1.442695, %v1496_v54  ;;  %v1497_v21 = vadd.f32 %v1422_v16, %v1351_v61  ;;  %v1499_v5 = vadd.f32 %v1493_v18, %v1353_v19 }
 0x7d2   :  { %1690 = vpow2.f32 %v1567_v12  ;;  %v1568_v58 = vmul.f32 -1.442695, %v1497_v21  ;;  %v1569_v51 = vmul.f32 -1.442695, %v1499_v5 }
 0x7d4   :  { %1692 = vpow2.f32 %v1568_v58 }
 0x7d5   :  { %1694 = vpow2.f32 %v1569_v51 }
 0x7df   :  { %v1691_v10 = vpop.eup %1690 }
 0x7e0   :  { %v1503_v1 = vadd.f32 1.0, %v1691_v10 }
 0x7e1   :  { %v1693_v48 = vpop.eup %1692 }
 0x7e2   :  { %1696 = vrcp.f32 %v1503_v1  ;;  %v1509_v50 = vadd.f32 1.0, %v1693_v48  ;;  %v1695_v46 = vpop.eup %1694 }
 0x7e3   :  { %1698 = vtanh.f32 %v1498_v0  ;;  %v1516_v9 = vadd.f32 1.0, %v1695_v46 }
 0x7e4   :  { %1700 = vrcp.f32 %v1509_v50 }
 0x7e5   :  { %1702 = vrcp.f32 %v1516_v9 }
 0x7ef   :  { %v1697_v59 = vpop.eup %1696 }
 0x7f0   :  { %v1699_v60 = vpop.eup %1698 }
 0x7f1   :  { %v1701_v52 = vpop.eup %1700  ;;  %v1520_v56 = vmul.f32 %v1699_v60, %v1697_v59 }
 0x7f2   :  { %v1519_v62 = vmul.f32 %v1701_v52, %v1344_v63  ;;  %v1703_v4 = vpop.eup %1702 }
 0x7f4   :  { %v1521_v2 = vadd.f32 %v1520_v56, %v1519_v62 }
 0x7f6   :  { %1704 = vtanh.f32 %v1521_v2 }
 0x803   :  { %v1705_v6 = vpop.eup %1704 }
 0x804   :  { %v1523_v8 = vmul.f32 %v1705_v6, %v1703_v4 }
 0x806   :  { %1525 = vst [vmem:[#allocation9 + $0x38] sm:$0xff] %v1523_v8 }
 0x807   :  { %1821 = shalt.err (!%p1818_p0)
}
 0x808   :  { %s1842_s22 = smov 128   ;;  %s1843_s23 = smov 8  }
 0x809   :  { %1539 = dma.vmem_to_hbm [thread:$0]  %s1534_s1, 1024, %s2680_s2, [#allocation6], %s1842_s22, %s1842_s22, %s1843_s23  }
 0x80a   :  { %1834 = dma.done.wait [#allocation6], 1024  }
 0x80b   :  { %1835 = vsyncadd [#allocation6], 4294966272 }
 0x80c   :  { %1543 = vsyncpa [#allocation5], 1 }
 0x80d   :  { %1544 = vsyncpa [#allocation8], 1 }
 0x80e   :  { %1545 = vsyncpa [#allocation6], 1 }

</bundles_post_ra>
